<compile_context>
chip_gen: v6e
topology: v6e:2x2x1
jax: 0.10.0
libtpu: 0.0.40
codegen_flags: <defaults>
</compile_context>

<pallas_src>
import jax
import jax.numpy as jnp
from jax.experimental import pallas as pl
from jax.experimental.pallas import tpu as pltpu


# ----------------------------- Pallas kernel ------------------------------- #

def _grouped_ffn_kernel(te_ref, ta_ref, tx_ref,          # SMEM scalar-prefetch tables
                        x_ref, w13_ref, w2_ref, wt_ref,   # VMEM inputs
                        o_ref, acc_ref):                  # output + f32 accumulator scratch
    """Grouped (token-sorted) expert FFN.  grid = (row_tiles, F_chunks).

    Each row tile holds tokens routed to a single expert (tile_expert[i]); the F
    axis accumulates into acc_ref.  Padding-only tiles are skipped (flags) and
    their weight/x DMA is deduplicated via the index_maps.
    """
    del te_ref, tx_ref                    # only used by the index_maps
    i = pl.program_id(0)
    f = pl.program_id(1)
    n_f = pl.num_programs(1)

    @pl.when(f == 0)
    def _():
        acc_ref[...] = jnp.zeros_like(acc_ref)

    active = ta_ref[i] != 0

    @pl.when(active)
    def _():
        x = x_ref[...]                                                        # (Tt, H)
        fc = w13_ref.shape[-1] // 2
        h13 = jnp.dot(x, w13_ref[...], preferred_element_type=jnp.float32)    # (Tt, 2*Fc)
        h1 = h13[:, :fc]
        h3 = h13[:, fc:]
        h = (h1 * jax.nn.sigmoid(h1)) * h3                                    # SiLU(x@W1) * (x@W3)
        # Routing weight folded into the per-chunk accumulation (no per-expert scratch).
        acc_ref[...] += wt_ref[...] * jnp.dot(h.astype(x.dtype), w2_ref[...],
                                              preferred_element_type=jnp.float32)

    @pl.when(f == n_f - 1)
    def _():
        o_ref[...] = acc_ref[...].astype(o_ref.dtype)     # zeros for padding-only tiles


# ------------------------------ helpers ------------------------------------ #

def _vmem_capacity_bytes():
    try:
        return int(pltpu.get_tpu_info().vmem_capacity_bytes)
    except Exception:
        return 128 * 1024 * 1024


def _round_up(x, m):
    return ((x + m - 1) // m) * m


def _vmem_estimate(t_tile, f_chunk, H, itemsize):
    weights = 2 * 3 * H * f_chunk * itemsize      # double-buffered w13 (H x 2Fc) + w2 (Fc x H)
    x_io = 2 * t_tile * H * itemsize              # x tile (double buffered)
    out_io = 2 * t_tile * H * itemsize            # output tile
    wt_io = 2 * t_tile * 4                        # f32 routing weights
    acc = t_tile * H * 4                          # f32 accumulator scratch
    temps = 3 * t_tile * (2 * f_chunk) * 4        # h13 / gated / product intermediates (f32)
    return weights + x_io + out_io + wt_io + acc + temps


def _select_tiles(T, H, F, itemsize, capacity):
    """Largest (t_tile, f_chunk) passing a hard per-core VMEM fit check (256-multiples preferred)."""
    budget = int(0.80 * capacity)
    t_cap = max(128, _round_up(2 * T, 128))
    for tt in (512, 256, 128):
        if tt > t_cap:
            continue
        for fc in (2048, 1024, 512, 256, 128):
            if fc > F or F % fc != 0:
                continue
            if _vmem_estimate(tt, fc, H, itemsize) <= budget:
                return tt, fc
    return 128, (128 if F % 128 == 0 else F)


def _pack_expert_weights(w1, w3, w2, f_chunk):
    """Fused gate/up weights, chunk-contiguous layout.

    TODO(synk): in production pack once at model load; per-forward packing is demo-only.
    """
    E, H, F = w1.shape
    n_f = F // f_chunk
    w1r = w1.reshape(E, H, n_f, f_chunk)
    w3r = w3.reshape(E, H, n_f, f_chunk)
    w13 = jnp.concatenate([w1r, w3r], axis=-1)            # (E, H, n_f, 2*Fc)
    w13 = jnp.transpose(w13, (0, 2, 1, 3))                # (E, n_f, H, 2*Fc)  contiguous per chunk
    w2c = w2.reshape(E, n_f, f_chunk, H)                  # (E, n_f, Fc, H)    contiguous per chunk
    return w13, w2c


# ------------------------------ JAX wrapper --------------------------------- #

def dynamic_skipping_moe_forward(hidden_states, params, beta, *, t_tile=None, f_chunk=None):
    B, S, H = hidden_states.shape
    T = B * S
    dtype = hidden_states.dtype
    x2d = hidden_states.reshape(T, H)

    gate_w = params["gate_w"]                               # (E, H)   nn.Linear(H, E) weight
    w1, w3, w2 = params["w1"], params["w3"], params["w2"]   # (E,H,F), (E,H,F), (E,F,H) pre-transposed
    E = gate_w.shape[0]
    F = w1.shape[2]

    # ---- router: tiny matmul + softmax / top-2 / beta-skip glue in plain XLA ----
    router_logits = jnp.dot(x2d, gate_w.T, preferred_element_type=jnp.float32).astype(dtype)
    probs = jax.nn.softmax(router_logits.astype(jnp.float32), axis=-1)
    top_w, top_idx = jax.lax.top_k(probs, 2)
    skip = top_w[:, 1] < beta * top_w[:, 0]
    w_hi = top_w[:, 0]
    w_lo = jnp.where(skip, 0.0, top_w[:, 1])
    denom = w_hi + w_lo
    w_hi = w_hi / denom
    w_lo = w_lo / denom

    # ---- tile selection (hard VMEM fit check) ----
    itemsize = jnp.dtype(dtype).itemsize
    capacity = _vmem_capacity_bytes()
    auto_tt, auto_fc = _select_tiles(T, H, F, itemsize, capacity)
    t_tile = auto_tt if t_tile is None else t_tile
    f_chunk = auto_fc if f_chunk is None else f_chunk
    assert t_tile % 128 == 0 and F % f_chunk == 0
    n_f = F // f_chunk
    n_rt = -(-2 * T // t_tile) + E              # upper bound on padded row tiles (static)
    C = n_rt * t_tile                           # static row capacity of the grouped layout

    # ---- grouped-GEMM bookkeeping: sort (token, expert, weight) assignments by expert ----
    tok_ids = jnp.arange(T, dtype=jnp.int32)
    expert_a = jnp.concatenate([top_idx[:, 0].astype(jnp.int32),
                                jnp.where(w_lo > 0.0, top_idx[:, 1], E).astype(jnp.int32)])
    token_a = jnp.concatenate([tok_ids, tok_ids])
    weight_a = jnp.concatenate([w_hi, w_lo]).astype(jnp.float32)

    order = jnp.argsort(expert_a)               # beta-skipped assignments (sentinel E) sort last
    tok_s = token_a[order]
    w_s = weight_a[order]

    g = jnp.sum(expert_a[:, None] == jnp.arange(E, dtype=jnp.int32)[None, :], axis=0).astype(jnp.int32)
    gp = ((g + t_tile - 1) // t_tile) * t_tile  # group sizes padded to row-tile multiples
    pend = jnp.cumsum(gp)
    pstart = pend - gp
    sstart = jnp.cumsum(g) - g

    r = jnp.arange(C, dtype=jnp.int32)
    e_of_r = jnp.sum(r[:, None] >= pend[None, :], axis=1).astype(jnp.int32)   # group of each padded row
    e_cl = jnp.minimum(e_of_r, E - 1)
    off = r - pstart[e_cl]
    valid = (e_of_r < E) & (off < g[e_cl])
    src = jnp.clip(sstart[e_cl] + off, 0, 2 * T - 1)
    row_token = jnp.where(valid, tok_s[src], 0)
    row_weight = jnp.where(valid, w_s[src], 0.0)[:, None]                     # (C, 1) f32 (stays f32)

    x_pad = jnp.take(x2d, row_token, axis=0)                                  # (C, H) gathered tokens

    # Per-tile metadata for scalar prefetch (expert id, activity, x/wt block dedup target).
    total_padded = jnp.sum(gp)
    n_active = total_padded // t_tile
    tiles = jnp.arange(n_rt, dtype=jnp.int32)
    tile_active = (tiles < n_active).astype(jnp.int32)
    raw_e = jnp.minimum(e_of_r[tiles * t_tile], E - 1)
    last_e = jnp.max(jnp.where(g > 0, jnp.arange(E, dtype=jnp.int32), 0)).astype(jnp.int32)
    tile_expert = jnp.where(tile_active == 1, raw_e, last_e).astype(jnp.int32)
    last_active = jnp.maximum(n_active - 1, 0).astype(jnp.int32)
    tile_xblk = jnp.where(tile_active == 1, tiles, last_active).astype(jnp.int32)

    # ---- packed, chunk-contiguous weights (fused gate/up) ----
    w13c, w2c = _pack_expert_weights(w1, w3, w2, f_chunk)

    # ---- index maps: inactive tiles re-use the previous tile's blocks -> Pallas skips the DMA ----
    def x_map(i, f, te, ta, tx):
        return (tx[i], 0)

    def w13_map(i, f, te, ta, tx):
        a = ta[i]
        return (te[i], a * f + (1 - a) * (n_f - 1), 0, 0)

    def w2_map(i, f, te, ta, tx):
        a = ta[i]
        return (te[i], a * f + (1 - a) * (n_f - 1), 0, 0)

    def wt_map(i, f, te, ta, tx):
        return (tx[i], 0)

    def out_map(i, f, te, ta, tx):
        return (i, 0)

    flops = 6 * C * H * F                                   # 2*C*H*2F (gate/up) + 2*C*F*H (down)
    bytes_accessed = itemsize * (n_rt * 3 * H * F + 2 * C * H) + 4 * C
    vmem_limit = int(min(0.85 * capacity,
                         max(1.5 * _vmem_estimate(t_tile, f_chunk, H, itemsize), 16 * 1024 * 1024)))

    y_pad = pl.pallas_call(
        _grouped_ffn_kernel,
        out_shape=jax.ShapeDtypeStruct((C, H), dtype),
        grid_spec=pltpu.PrefetchScalarGridSpec(
            num_scalar_prefetch=3,
            grid=(n_rt, n_f),
            in_specs=[
                pl.BlockSpec((t_tile, H), x_map),                          # gathered token tile
                pl.BlockSpec((None, None, H, 2 * f_chunk), w13_map),       # fused gate/up chunk
                pl.BlockSpec((None, None, f_chunk, H), w2_map),            # down-proj chunk
                pl.BlockSpec((t_tile, 1), wt_map),                         # f32 routing weights
            ],
            out_specs=pl.BlockSpec((t_tile, H), out_map),
            scratch_shapes=[pltpu.VMEM((t_tile, H), jnp.float32)],         # f32 accumulator
        ),
        compiler_params=pltpu.CompilerParams(
            dimension_semantics=("parallel", "arbitrary"),
            vmem_limit_bytes=vmem_limit,
        ),
        cost_estimate=pl.CostEstimate(flops=flops, transcendentals=C * F,
                                      bytes_accessed=bytes_accessed),
    )(tile_expert, tile_active, tile_xblk, x_pad, w13c, w2c, row_weight)

    # Scatter-add the (already weight-scaled) per-assignment outputs back to token order.
    out2d = jnp.zeros((T, H), jnp.float32).at[row_token].add(y_pad.astype(jnp.float32))
    return out2d.astype(dtype).reshape(B, S, H), router_logits


# --------------------------- pure-JAX reference ----------------------------- #

def reference_forward(hidden_states, params, beta):
    B, S, H = hidden_states.shape
    T = B * S
    dtype = hidden_states.dtype
    x2d = hidden_states.reshape(T, H)
    gate_w, w1, w3, w2 = params["gate_w"], params["w1"], params["w3"], params["w2"]
    E = gate_w.shape[0]

    logits = jnp.dot(x2d, gate_w.T, preferred_element_type=jnp.float32).astype(dtype)
    probs = jax.nn.softmax(logits.astype(jnp.float32), axis=-1)
    top_w, top_idx = jax.lax.top_k(probs, 2)
    mask = top_w[:, 1] < beta * top_w[:, 0]
    top_w = top_w.at[:, 1].set(jnp.where(mask, 0.0, top_w[:, 1]))
    top_w = top_w / jnp.sum(top_w, axis=-1, keepdims=True)

    out = jnp.zeros((T, H), jnp.float32)
    for e in range(E):
        h1 = x2d @ w1[e]
        h3 = x2d @ w3[e]
        y = (jax.nn.silu(h1) * h3) @ w2[e]
        w_e = (jnp.where(top_idx[:, 0] == e, top_w[:, 0], 0.0)
               + jnp.where(top_idx[:, 1] == e, top_w[:, 1], 0.0))
        out = out + y.astype(jnp.float32) * w_e[:, None]
    return out.astype(dtype).reshape(B, S, H), logits


# ---------------------------------- main ------------------------------------ #

if __name__ == "__main__":
    key = jax.random.PRNGKey(0)
    beta = 0.75
    B, S, H, F, E = 2, 128, 128, 256, 8    # T = 256 tokens

    k0, k1, k2, k3, k4 = jax.random.split(key, 5)
    hidden_states = jax.random.normal(k0, (B, S, H), jnp.float32)
    params = {
        "gate_w": jax.random.normal(k1, (E, H), jnp.float32) * 0.10,        # nn.Linear(H, E)
        "w1": jax.random.normal(k2, (E, H, F), jnp.float32) * (H ** -0.5),  # Linear(H, F), pre-T
        "w3": jax.random.normal(k3, (E, H, F), jnp.float32) * (H ** -0.5),  # Linear(H, F), pre-T
        "w2": jax.random.normal(k4, (E, F, H), jnp.float32) * (F ** -0.5),  # Linear(F, H), pre-T
    }

    # --- config 1: explicit small tiles -> exercises multi F-chunk accumulation + some inactive tiles ---
    out, logits = dynamic_skipping_moe_forward(hidden_states, params, beta, t_tile=128, f_chunk=128)
    jax.block_until_ready((out, logits))
    ref_out, ref_logits = reference_forward(hidden_states, params, beta)
    assert out.shape == (B, S, H) and logits.shape == (B * S, E)
    assert jnp.allclose(out, ref_out, rtol=2e-4, atol=2e-4)
    assert jnp.allclose(logits, ref_logits, rtol=2e-4, atol=2e-4)

    # --- config 2: tiny T (decode-like) with auto tiles -> most row tiles are padding-only (skip path) ---
    hs_small = hidden_states[:1, :8]                   # (1, 8, H) -> T = 8
    out2, logits2 = dynamic_skipping_moe_forward(hs_small, params, beta)
    jax.block_until_ready((out2, logits2))
    ref_out2, ref_logits2 = reference_forward(hs_small, params, beta)
    assert jnp.allclose(out2, ref_out2, rtol=2e-4, atol=2e-4)
    assert jnp.allclose(logits2, ref_logits2, rtol=2e-4, atol=2e-4)

    # --- config 3: bf16 smoke run (production dtype; f32 accumulation + f32 routing weights in-kernel) ---
    hs_bf16 = hidden_states.astype(jnp.bfloat16)
    params_bf16 = {k: v.astype(jnp.bfloat16) for k, v in params.items()}
    out_bf16, _ = dynamic_skipping_moe_forward(hs_bf16, params_bf16, beta)
    jax.block_until_ready(out_bf16)
    assert bool(jnp.all(jnp.isfinite(out_bf16.astype(jnp.float32))))

    print("KERNEL_OK")
</pallas_src>

<mosaic_0001>
module attributes {stable_mosaic.version = 11 : i64} {
  func.func @_grouped_ffn_kernel(%arg0: i32, %arg1: i32, %arg2: memref<12xi32, #tpu.memory_space<smem>>, %arg3: memref<12xi32, #tpu.memory_space<smem>>, %arg4: memref<12xi32, #tpu.memory_space<smem>>, %arg5: memref<128x128xf32, #tpu.memory_space<vmem>>, %arg6: memref<1x1x128x256xf32, #tpu.memory_space<vmem>>, %arg7: memref<1x1x128x128xf32, #tpu.memory_space<vmem>>, %arg8: memref<128x1xf32, #tpu.memory_space<vmem>>, %arg9: memref<128x128xf32, #tpu.memory_space<vmem>>, %arg10: memref<128x128xf32, #tpu.memory_space<vmem>>) attributes {dimension_semantics = [#tpu.dimension_semantics<parallel>, #tpu.dimension_semantics<arbitrary>], iteration_bounds = array<i64: 12, 2>, scalar_prefetch = 3 : i64, scratch_operands = 1 : i64, tpu.core_type = #tpu.core_type<tc>, window_params = [{transform_indices = @transform_0, window_bounds = array<i64: 128, 128>}, {transform_indices = @transform_1, window_bounds = array<i64: 1, 1, 128, 256>}, {transform_indices = @transform_2, window_bounds = array<i64: 1, 1, 128, 128>}, {transform_indices = @transform_3, window_bounds = array<i64: 128, 1>}, {transform_indices = @transform_4, window_bounds = array<i64: 128, 128>}]} {
    %c0_i32 = arith.constant 0 : i32
    %0 = arith.cmpi eq, %arg1, %c0_i32 : i32
    %1 = arith.extui %0 : i1 to i32
    %c0_i32_0 = arith.constant 0 : i32
    %2 = arith.cmpi ne, %1, %c0_i32_0 : i32
    scf.if %2 {
      %cst = arith.constant 0.000000e+00 : f32
      %11 = vector.broadcast %cst : f32 to vector<128x128xf32>
      %c0 = arith.constant 0 : index
      %c0_4 = arith.constant 0 : index
      %12 = vector.load %arg10[%c0, %c0_4] : memref<128x128xf32, #tpu.memory_space<vmem>>, vector<128x128xf32>
      tpu.vector_store %arg10[%c0, %c0_4], %11 {strides = array<i32>} : memref<128x128xf32, #tpu.memory_space<vmem>>, vector<128x128xf32>,
    } else {
    }
    %3 = arith.index_cast %arg0 : i32 to index
    %4 = memref.load %arg3[%3] : memref<12xi32, #tpu.memory_space<smem>>
    %c0_i32_1 = arith.constant 0 : i32
    %5 = arith.cmpi ne, %4, %c0_i32_1 : i32
    %6 = arith.extui %5 : i1 to i32
    %c0_i32_2 = arith.constant 0 : i32
    %7 = arith.cmpi ne, %6, %c0_i32_2 : i32
    scf.if %7 {
      %c0 = arith.constant 0 : index
      %c0_4 = arith.constant 0 : index
      %11 = vector.load %arg5[%c0, %c0_4] : memref<128x128xf32, #tpu.memory_space<vmem>>, vector<128x128xf32>
      %c0_5 = arith.constant 0 : index
      %c0_6 = arith.constant 0 : index
      %c0_7 = arith.constant 0 : index
      %c0_8 = arith.constant 0 : index
      %12 = vector.load %arg6[%c0_5, %c0_6, %c0_7, %c0_8] : memref<1x1x128x256xf32, #tpu.memory_space<vmem>>, vector<1x1x128x256xf32>
      %13 = vector.shape_cast %12 : vector<1x1x128x256xf32> to vector<128x256xf32>
      %cst = arith.constant dense<0.000000e+00> : vector<128x256xf32>
      %14 = tpu.matmul %11, %13, %cst {dimension_numbers = #tpu.dot_dimension_numbers<[1], [0], [0], [1], [0, 0, 1, 1], [], []>} : vector<128x128xf32>, vector<128x256xf32>, vector<128x256xf32> -> vector<128x256xf32>
      %15 = vector.extract_strided_slice %14 {offsets = [0, 0], sizes = [128, 128], strides = [1, 1]} : vector<128x256xf32> to vector<128x128xf32>
      %16 = vector.extract_strided_slice %14 {offsets = [0, 128], sizes = [128, 128], strides = [1, 1]} : vector<128x256xf32> to vector<128x128xf32>
      %17 = arith.negf %15 : vector<128x128xf32>
      %18 = math.exp %17 : vector<128x128xf32>
      %cst_9 = arith.constant 1.000000e+00 : f32
      %19 = vector.broadcast %cst_9 : f32 to vector<128x128xf32>
      %20 = arith.addf %19, %18 : vector<128x128xf32>
      %21 = arith.divf %19, %20 : vector<128x128xf32>
      %22 = arith.mulf %15, %21 : vector<128x128xf32>
      %23 = arith.mulf %22, %16 : vector<128x128xf32>
      %c0_10 = arith.constant 0 : index
      %c0_11 = arith.constant 0 : index
      %24 = vector.load %arg10[%c0_10, %c0_11] : memref<128x128xf32, #tpu.memory_space<vmem>>, vector<128x128xf32>
      %c0_12 = arith.constant 0 : index
      %c0_13 = arith.constant 0 : index
      %25 = vector.load %arg8[%c0_12, %c0_13] : memref<128x1xf32, #tpu.memory_space<vmem>>, vector<128x1xf32>
      %c0_14 = arith.constant 0 : index
      %c0_15 = arith.constant 0 : index
      %c0_16 = arith.constant 0 : index
      %c0_17 = arith.constant 0 : index
      %26 = vector.load %arg7[%c0_14, %c0_15, %c0_16, %c0_17] : memref<1x1x128x128xf32, #tpu.memory_space<vmem>>, vector<1x1x128x128xf32>
      %27 = vector.shape_cast %26 : vector<1x1x128x128xf32> to vector<128x128xf32>
      %cst_18 = arith.constant dense<0.000000e+00> : vector<128x128xf32>
      %28 = tpu.matmul %23, %27, %cst_18 {dimension_numbers = #tpu.dot_dimension_numbers<[1], [0], [0], [1], [0, 0, 1, 1], [], []>} : vector<128x128xf32>, vector<128x128xf32>, vector<128x128xf32> -> vector<128x128xf32>
      %29 = vector.broadcast %25 : vector<128x1xf32> to vector<128x128xf32>
      %30 = arith.mulf %29, %28 : vector<128x128xf32>
      %31 = arith.addf %24, %30 : vector<128x128xf32>
      %c0_19 = arith.constant 0 : index
      %c0_20 = arith.constant 0 : index
      %32 = vector.load %arg10[%c0_19, %c0_20] : memref<128x128xf32, #tpu.memory_space<vmem>>, vector<128x128xf32>
      tpu.vector_store %arg10[%c0_19, %c0_20], %31 {strides = array<i32>} : memref<128x128xf32, #tpu.memory_space<vmem>>, vector<128x128xf32>,
    } else {
    }
    %c1_i32 = arith.constant 1 : i32
    %8 = arith.cmpi eq, %arg1, %c1_i32 : i32
    %9 = arith.extui %8 : i1 to i32
    %c0_i32_3 = arith.constant 0 : i32
    %10 = arith.cmpi ne, %9, %c0_i32_3 : i32
    scf.if %10 {
      %c0 = arith.constant 0 : index
      %c0_4 = arith.constant 0 : index
      %11 = vector.load %arg10[%c0, %c0_4] : memref<128x128xf32, #tpu.memory_space<vmem>>, vector<128x128xf32>
      %c0_5 = arith.constant 0 : index
      %c0_6 = arith.constant 0 : index
      %12 = vector.load %arg9[%c0_5, %c0_6] : memref<128x128xf32, #tpu.memory_space<vmem>>, vector<128x128xf32>
      tpu.vector_store %arg9[%c0_5, %c0_6], %11 {strides = array<i32>} : memref<128x128xf32, #tpu.memory_space<vmem>>, vector<128x128xf32>,
    } else {
    }
    return
  }
  func.func @transform_0(%arg0: i32, %arg1: i32, %arg2: memref<12xi32, #tpu.memory_space<smem>>, %arg3: memref<12xi32, #tpu.memory_space<smem>>, %arg4: memref<12xi32, #tpu.memory_space<smem>>) -> (i32, i32) {
    %0 = arith.index_cast %arg0 : i32 to index
    %1 = memref.load %arg4[%0] : memref<12xi32, #tpu.memory_space<smem>>
    %c0_i32 = arith.constant 0 : i32
    %c0_i32_0 = arith.constant 0 : i32
    return %1, %c0_i32 : i32, i32
  }
  func.func @transform_1(%arg0: i32, %arg1: i32, %arg2: memref<12xi32, #tpu.memory_space<smem>>, %arg3: memref<12xi32, #tpu.memory_space<smem>>, %arg4: memref<12xi32, #tpu.memory_space<smem>>) -> (i32, i32, i32, i32) {
    %0 = arith.index_cast %arg0 : i32 to index
    %1 = memref.load %arg3[%0] : memref<12xi32, #tpu.memory_space<smem>>
    %2 = arith.index_cast %arg0 : i32 to index
    %3 = memref.load %arg2[%2] : memref<12xi32, #tpu.memory_space<smem>>
    %4 = arith.muli %1, %arg1 : i32
    %c1_i32 = arith.constant 1 : i32
    %5 = arith.subi %c1_i32, %1 : i32
    %c1_i32_0 = arith.constant 1 : i32
    %6 = arith.muli %5, %c1_i32_0 : i32
    %7 = arith.addi %4, %6 : i32
    %c0_i32 = arith.constant 0 : i32
    %c0_i32_1 = arith.constant 0 : i32
    %c0_i32_2 = arith.constant 0 : i32
    return %3, %7, %c0_i32, %c0_i32_1 : i32, i32, i32, i32
  }
  func.func @transform_2(%arg0: i32, %arg1: i32, %arg2: memref<12xi32, #tpu.memory_space<smem>>, %arg3: memref<12xi32, #tpu.memory_space<smem>>, %arg4: memref<12xi32, #tpu.memory_space<smem>>) -> (i32, i32, i32, i32) {
    %0 = arith.index_cast %arg0 : i32 to index
    %1 = memref.load %arg3[%0] : memref<12xi32, #tpu.memory_space<smem>>
    %2 = arith.index_cast %arg0 : i32 to index
    %3 = memref.load %arg2[%2] : memref<12xi32, #tpu.memory_space<smem>>
    %4 = arith.muli %1, %arg1 : i32
    %c1_i32 = arith.constant 1 : i32
    %5 = arith.subi %c1_i32, %1 : i32
    %c1_i32_0 = arith.constant 1 : i32
    %6 = arith.muli %5, %c1_i32_0 : i32
    %7 = arith.addi %4, %6 : i32
    %c0_i32 = arith.constant 0 : i32
    %c0_i32_1 = arith.constant 0 : i32
    %c0_i32_2 = arith.constant 0 : i32
    return %3, %7, %c0_i32, %c0_i32_1 : i32, i32, i32, i32
  }
  func.func @transform_3(%arg0: i32, %arg1: i32, %arg2: memref<12xi32, #tpu.memory_space<smem>>, %arg3: memref<12xi32, #tpu.memory_space<smem>>, %arg4: memref<12xi32, #tpu.memory_space<smem>>) -> (i32, i32) {
    %0 = arith.index_cast %arg0 : i32 to index
    %1 = memref.load %arg4[%0] : memref<12xi32, #tpu.memory_space<smem>>
    %c0_i32 = arith.constant 0 : i32
    %c0_i32_0 = arith.constant 0 : i32
    return %1, %c0_i32 : i32, i32
  }
  func.func @transform_4(%arg0: i32, %arg1: i32, %arg2: memref<12xi32, #tpu.memory_space<smem>>, %arg3: memref<12xi32, #tpu.memory_space<smem>>, %arg4: memref<12xi32, #tpu.memory_space<smem>>) -> (i32, i32) {
    %c0_i32 = arith.constant 0 : i32
    %c0_i32_0 = arith.constant 0 : i32
    return %arg0, %c0_i32 : i32, i32
  }
}

</mosaic_0001>

<bundles_post_ra>
// kernel: tpu_custom_call.1
= control target key start
LH: loop header
LB: loop body
LE: loop exit
PB: predicated region body
PF: predicated region fallthrough
CT: control target
= control target key end

     0   :  { %s1961_s24 = smov [#allocation4]   ;;  %s1962_s27 = smov [#allocation5]   ;;  %s2713_s0 = inlined_call_operand.hbm [shape: s32[12], index: 0, kind: input, shape index: {}]   ;;  %s2714_s3 = inlined_call_operand.hbm [shape: f32[1536,128], index: 3, kind: input, shape index: {}]   ;;  %s2715_s4 = inlined_call_operand.hbm [shape: f32[8,2,128,256], index: 4, kind: input, shape index: {}]   ;;  %s2716_s5 = inlined_call_operand.hbm [shape: f32[8,2,128,128], index: 5, kind: input, shape index: {}]   ;;  %s2717_s6 = inlined_call_operand.vmem [shape: f32[1536,1], index: 6, kind: input, shape index: {}]   ;;  %s2718_s7 = inlined_call_operand.hbm [shape: f32[1536,128], index: 7, kind: output, shape index: {}]   ;;  %s2719_s1 = inlined_call_operand.hbm [shape: s32[12], index: 1, kind: input, shape index: {}]   ;;  %s2720_s2 = inlined_call_operand.hbm [shape: s32[12], index: 2, kind: input, shape index: {}]  }
   0x1   :  { %2750 = sst [smem:[#allocation47_spill]] %s2714_s3  ;;  %s1963_s30 = smov [#allocation6]  }
   0x2   :  { %2751 = sst [smem:[#allocation48_spill]] %s2715_s4 }
   0x3   :  { %2752 = sst [smem:[#allocation49_spill]] %s2716_s5 }
   0x4   :  { %2753 = sst [smem:[#allocation50_spill]] %s2717_s6 }
   0x5   :  { %2754 = sst [smem:[#allocation51_spill]] %s2718_s7 }
   0x6   :  { %13 = dma.hbm_to_smem %s2713_s0, 16, %s1961_s24, [#allocation3] }
   0x7   :  { %15 = dma.hbm_to_smem %s2719_s1, 16, %s1962_s27, [#allocation3] }
   0x8   :  { %17 = dma.hbm_to_smem %s2720_s2, 16, %s1963_s30, [#allocation3] }
   0x9   :  { %1875 = dma.done.wait [#allocation3], 48 }
   0xa   :  { %1876 = vsyncadd [#allocation3], 4294967248 }
   0xb   :  { %19 = sfence }
   0xc   :  { %20 = vsyncpa [#allocation8], 0 }
   0xd   :  { %22 = vsyncpa [#allocation8 + $0x1], 0 }
   0xe   :  { %23 = vsyncpa [#allocation11], 0 }
   0xf   :  { %25 = vsyncpa [#allocation11 + $0x1], 0 }
  0x10   :  { %26 = vsyncpa [#allocation9], 0 }
  0x11   :  { %28 = vsyncpa [#allocation9 + $0x1], 0  ;;  %s2026_s0 = smov 0   ;;  %s2028_s10 = smov 0  }
  0x12   :  { %s2030_s11 = smov 0   ;;  %s2032_s1 = smov 0  }
  0x13   :  { %s2034_s12 = smov 0   ;;  %s2036_s2 = smov 0  }
  0x14   :  { %s2038_s13 = smov 0   ;;  %s2040_s14 = smov 0  }
  0x15   :  { %s2042_s15 = smov 0   ;;  %s2044_s16 = smov 0  }
  0x16   :  { %s2046_s17 = smov 0   ;;  %s2048_s18 = smov 0  }
  0x17   :  { %s2050_s19 = smov 0   ;;  %s2052_s20 = smov 0  }
  0x18   :  { %s2054_s21 = smov 0   ;;  %s2056_s22 = smov 0  }
  0x19   :  { %s2058_s23 = smov 0  }
  0x1a LB: > { %2755 = sst [smem:[#allocation29_spill]] %s1895_s0  ;;  %s2112_s24 = sadd.s32 4294967295, %s1959_s23   ;;  %s1959_s23 = sphi %s2058_s23, %s34_s23   ;;  %s1955_s22 = sphi %s2056_s22, %s2837_s22   ;;  %s1951_s21 = sphi %s2054_s21, %s2847_s21   ;;  %s1947_s20 = sphi %s2052_s20, %s2835_s20   ;;  %s1943_s19 = sphi %s2050_s19, %s2846_s19   ;;  %s1939_s18 = sphi %s2048_s18, %s2845_s18   ;;  %s1935_s17 = sphi %s2046_s17, %s2844_s17   ;;  %s1931_s16 = sphi %s2044_s16, %s2843_s16   ;;  %s1927_s15 = sphi %s2042_s15, %s2833_s15   ;;  %s1923_s14 = sphi %s2040_s14, %s2842_s14   ;;  %s1919_s13 = sphi %s2038_s13, %s2831_s13   ;;  %s1915_s2 = sphi %s2036_s2, %s2841_s2   ;;  %s1911_s12 = sphi %s2034_s12, %s2830_s12   ;;  %s1907_s1 = sphi %s2032_s1, %s2829_s1   ;;  %s1903_s11 = sphi %s2030_s11, %s2828_s11   ;;  %s1899_s10 = sphi %s2028_s10, %s2839_s10   ;;  %s1895_s0 = sphi %s2026_s0, %s2838_s0  }
  0x1b   : > { %2756 = sst [smem:[#allocation30_spill]] %s1903_s11  ;;  %s43_s26 = sadd.s32 1, %s1951_s21 }
  0x1c   : > { %2757 = sst [smem:[#allocation31_spill]] %s1907_s1  ;;  %p44_p0 = scmp.ge.s32.totalorder %s43_s26, 2 }
  0x1d   : > { %2758 = sst [smem:[#allocation32_spill]] %s1911_s12  ;;  %s46_s27 = sadd.s32 1, %s1955_s22 }
  0x1e   : > { %2759 = sst [smem:[#allocation33_spill]] %s1915_s2  ;;  %p2737_p1 = scmp.eq.s32.totalorder %s1959_s23, 0 }
  0x1f   : > { %2760 = sst [smem:[#allocation34_spill]] %s1923_s14  ;;  %s2849_s26 = smov (%p44_p0, %s43_s26), 0 }
  0x20   : > { %2761 = sst [smem:[#allocation35_spill]] %s1927_s15  ;;  %s2851_s27 = smov (!%p44_p0, %s46_s27), %s1955_s22 }
  0x21   : > { %2762 = sst [smem:[#allocation36_spill]] %s1943_s19  ;;  %p2736_p2 = scmp.eq.s32.totalorder %s2112_s24, 0 }
  0x22   : > { %2763 = sst [smem:[#allocation37_spill]] %s1947_s20  ;;  %p48_p3 = scmp.ge.s32.totalorder %s2851_s27, 12 }
  0x23   : > { %2764 = sst [smem:[#allocation38_spill]] %s1955_s22  ;;  %p100_p4 = scmp.ne.s32.totalorder %s1927_s15, %s1923_s14 }
  0x24   : > { %s78_s28 = sld [smem:[#allocation5 + %s1955_s22]]  ;;  %p106_p5 = scmp.ne.s32.totalorder %s1923_s14, %s1919_s13 }
  0x25   : > { %2765 = sst [smem:[#allocation39_spill]] %s2849_s26  ;;  %s2853_s27 = smov (%p48_p3, %s2851_s27), 0 }
  0x26   : > { %s2124_s29 = sld [smem:[#allocation4 + %s1955_s22]]  ;;  %s93_s7 = sadd.s32 1, %s1927_s15 }
  0x27   : > { %s116_s30 = sld [smem:[#allocation5 + %s1955_s22]]  ;;  %p2139_p6 = por %p100_p4, %p2737_p1 }
  0x28   : > { %2766 = sst [smem:[#allocation40_spill]] %s2853_s27  ;;  %p2145_p7 = por %p106_p5, %p2736_p2 }
  0x29   : > { %s83_s25 = sld [smem:[#allocation5 + %s2853_s27]]  ;;  %s182_s1 = ssub.s32 %s1955_s22, %s2853_s27 }
  0x2a   : > { %s80_s8 = smul.u32 %s1951_s21, %s78_s28  ;;  %s81_s9 = ssub.s32 1, %s78_s28 }
  0x2b   : > { %s84_s19 = sld [smem:[#allocation4 + %s2853_s27]]  ;;  %s185_s12 = sadd.s32 1, %s1903_s11 }
  0x2c   : > { %s82_s6 = sadd.s32 %s81_s9, %s80_s8  ;;  %s2151_s5 = sld [smem:[#allocation5 + %s2853_s27]] }
  0x2d   : > { %s2768_s20 = scalar_select %p2145_p7, 1, 0 }
  0x2e   : > { %s118_s28 = smul.u32 %s1951_s21, %s116_s30  ;;  %s119_s14 = ssub.s32 1, %s116_s30 }
  0x2f   : > { %2769 = sst [smem:[#allocation41_spill]] %s2768_s20  ;;  %s85_s8 = smul.u32 %s83_s25, %s2849_s26 }
  0x30   : > { %s2155_s2 = sadd.s32 %s119_s14, %s118_s28  ;;  %s86_s9 = ssub.s32 1, %s83_s25 }
  0x31   : > { %s88_s3 = ssub.s32 %s2124_s29, %s84_s19  ;;  %p195_p8 = scmp.ne.s32.totalorder %s1903_s11, %s1899_s10 }
  0x32   : > { %s87_s20 = sadd.s32 %s86_s9, %s85_s8  ;;  %p183_p9 = scmp.eq.s32.totalorder %s182_s1, 0 }
  0x33   : > { %s89_s30 = ssub.s32 %s82_s6, %s87_s20  ;;  %p196_p10 = scmp.eq.s32.totalorder %s2112_s24, 23 }
  0x34   : > { %s90_s14 = sor.u32 %s89_s30, %s88_s3  ;;  %p201_p11 = scmp.ne.s32.totalorder %s1899_s10, %s1895_s0 }
  0x35   : > { %p91_p12 = scmp.eq.s32.totalorder %s90_s14, 0  ;;  %p2165_p13 = por %p196_p10, %p195_p8 }
  0x36   : > { %s2170_s19 = scalar_select %p183_p9, %s1903_s11, %s185_s12  }
  0x37   : > { %s2770_s25 = scalar_select %p2165_p13, 1, 0 }
  0x38   : > { %2772 = sst [smem:[#allocation43_spill]] %s2170_s19  ;;  %s2774_s1 = sadd.s32 4294967294, %s1959_s23  }
  0x39   : > { %2771 = sst [smem:[#allocation42_spill]] %s2770_s25  ;;  %p202_p0 = scmp.eq.s32.totalorder %s2774_s1, 23 }
  0x3a   : > { %s2173_s29 = scalar_select %p91_p12, %s1927_s15, %s93_s7  }
  0x3b   : > { %p2735_p3 = scmp.lt.s32.totalorder %s1959_s23, 24  ;;  %s244_s6 = sand.u32 1, %s1959_s23  }
  0x3c   : > { %2773 = sst [smem:[#allocation44_spill]] %s2173_s29  ;;  %p2179_p4 = por %p202_p0, %p201_p11 }
  0x3d   : > { %s246_s20 = sand.u32 1, %s1927_s15   ;;  %p2188_p5 = pnand %p2735_p3, %p2139_p6 }
  0x3e   : > { %s2775_s3 = scalar_select %p2179_p4, 1, 0 }
  0x3f   : > { %s1286_s7 = sshll.u32 %s246_s20, 8  ;;  %p1294_p8 = scmp.ge.s32.totalorder %s1959_s23, 1 }
  0x40   : > { %2776 = sst [smem:[#allocation45_spill]] %s2775_s3  ;;  %s248_s14 = scalar_lea.vmem [#allocation10], %s1286_s7 }
  0x41   : > { %s1418_s28 = scalar_select %p2139_p6, [#allocation5], [#allocation15] }
  0x42   : > { %s1419_s8 = scalar_select %p2139_p6, %s1955_s22, 0 }
  0x43   : > { %s2855_s28 = smov (!%p2735_p3, %s1418_s28), [#allocation20]  ;;  %s262_s1 = sshll.u32 %s248_s14, 4  ;;  %s2205_s1 = int_to_ptr.vmem [resolvable:$true] %s262_s1 }
  0x44   : > { %s2857_s8 = smov (!%p2735_p3, %s1419_s8), 0  ;;  %p309_p9 = scmp.lt.s32.totalorder %s1959_s23, 25 }
  0x45   : > { %s1420_s9 = scalar_select %p2139_p6, [#allocation4], [#allocation16] }
  0x46   : > { %s249_s30 = sld [smem:[%s2855_s28 + %s2857_s8]]  ;;  %p2210_p10 = pnand %p1294_p8, %p309_p9 }
  0x47   : > { %s2859_s9 = smov (!%p2735_p3, %s1420_s9), [#allocation21]  ;;  %s2779_s4 = sld [smem:[#allocation48_spill]] }
  0x48   : > { %s250_s29 = sld [smem:[%s2859_s9 + %s2857_s8]]  ;;  %s2219_s8 = scalar_lea.sflag [#allocation11], %s244_s6 }
  0x49   : > { %s2778_s19 = scalar_select %p2210_p10, 1, 0 }
  0x4a   : > { %p1699_p11 = pneg %p2188_p5 }
  0x4c   : > { %s251_s20 = smul.u32 %s1951_s21, %s249_s30  ;;  %s252_s15 = ssub.s32 1, %s249_s30 }
  0x4e   : > { %s253_s11 = sadd.s32 %s252_s15, %s251_s20  ;;  %s1288_s3 = sshll.u32 %s250_s29, 6 }
  0x4f   : > { %s1287_s13 = sshll.u32 %s253_s11, 5  ;;  %s1702_s29 = scalar_lea.hbm %s2779_s4, 65536 }
  0x50   : > { %s259_s28 = sadd.s32 %s1288_s3, %s1287_s13 }
  0x51   : > { %s1289_s7 = sshll.u32 %s259_s28, 7 }
  0x52   : > { %s2217_s25 = scalar_lea.hbm %s2779_s4, %s1289_s7 }
  0x53   : > { %s1697_s9 = scalar_lea.hbm %s2217_s25, 4096  ;;  %p1703_p8 = scmp.lt.s32.totalorder %s2217_s25, %s2779_s4 }
  0x54   : > { %p1698_p6 = scmp.ne.s32.totalorder %s2217_s25, %s1697_s9  ;;  %p1704_p9 = scmp.lt.s32.totalorder %s1702_s29, %s1697_s9 }
  0x56   : > { %p1700_p12 = pnand %p1699_p11, %p1698_p6  ;;  %p1705_p3 = por %p1704_p9, %p1703_p8 }
  0x58   : > { %p1701_p0 = pneg %p1700_p12 }
  0x5a   : > { %p1706_p2 = pnand %p1705_p3, %p1701_p0 }
  0x5c   : > { %1709 = shalt.err (!%p1706_p2)
}
  0x5d   : > { %s1710_s0 = scalar_lea.vmem %s2205_s1, 4096  ;;  %s1964_s6 = smov [#allocation10]  }
  0x5e   : > { %p1711_p1 = scmp.ne.s32.totalorder %s2205_s1, %s1710_s0  ;;  %s1715_s20 = sshll.u32 %s1964_s6, 4  ;;  %s1716_s20 = int_to_ptr.vmem [resolvable:$false] %s1715_s20 }
  0x5f   : > { %s1717_s13 = scalar_lea.vmem %s1716_s20, 8192  ;;  %p1718_p12 = scmp.lt.s32.totalorder %s2205_s1, %s1716_s20 }
  0x60   : > { %p1713_p4 = pnand %p1711_p1, %p1699_p11  ;;  %p1719_p13 = scmp.lt.s32.totalorder %s1717_s13, %s1710_s0 }
  0x62   : > { %p1714_p6 = pneg %p1713_p4  ;;  %p1720_p7 = por %p1719_p13, %p1718_p12 }
  0x64   : > { %p1721_p10 = pnand %p1720_p7, %p1714_p6 }
  0x66   : > { %1724 = shalt.err (!%p1721_p10)
}
  0x67   : > { %s1965_s28 = smov 256   ;;  %s1966_s7 = smov 16  }
  0x68   : > { %1445 = dma.hbm_to_vmem [thread:$0]  (!%p2188_p5), %s2217_s25, 4096, %s2205_s1, %s2219_s8, %s1965_s28, %s1965_s28, %s1966_s7  }
  0x69   : > { %s123_s14 = smul.u32 %s2151_s5, %s2849_s26  ;;  %s50_s9 = sld [smem:[#allocation6 + %s1955_s22]] }
  0x6a   : > { %s51_s11 = sld [smem:[#allocation6 + %s2853_s27]]  ;;  %p62_p1 = scmp.ne.s32.totalorder %s1939_s18, %s1935_s17 }
  0x6b   : > { %p68_p2 = scmp.ne.s32.totalorder %s1935_s17, %s1931_s16  ;;  %s222_s15 = sand.u32 1, %s1939_s18  }
  0x6c   : > { %s55_s29 = sadd.s32 1, %s1939_s18  ;;  %p2780_p7 = scmp.eq.s32.totalorder %s1959_s23, 0 }
  0x6d   : > { %p2781_p3 = scmp.eq.s32.totalorder %s2112_s24, 0  ;;  %s1283_s25 = sshll.u32 %s222_s15, 7 }
  0x6e   : > { %p64_p13 = por %p2780_p7, %p62_p1  ;;  %p2783_p5 = scmp.lt.s32.totalorder %s1959_s23, 24 }
  0x6f   : > { %p2254_p4 = por %p2781_p3, %p68_p2  ;;  %s226_s16 = scalar_lea.vmem [#allocation7], %s1283_s25 }
  0x70   : > { %s1415_s12 = scalar_select %p64_p13, [#allocation6], [#allocation14] }
  0x71   : > { %s2782_s3 = scalar_select %p2254_p4, 1, 0 }
  0x72   : > { %s52_s1 = ssub.s32 %s50_s9, %s51_s11  ;;  %p2260_p10 = pnand %p2783_p5, %p64_p13 }
  0x73   : > { %p53_p11 = scmp.eq.s32.totalorder %s52_s1, 0  ;;  %s234_s0 = sshll.u32 %s226_s16, 4  ;;  %s2272_s0 = int_to_ptr.vmem [resolvable:$true] %s234_s0 }
  0x74   : > { %s1416_s6 = scalar_select %p64_p13, %s1955_s22, 0 }
  0x75   : > { %s2266_s20 = scalar_select %p53_p11, %s1939_s18, %s55_s29  }
  0x76   : > { %p2786_p0 = pmov %p2783_p5  ;;  %s2275_s28 = sld [smem:[#allocation4 + %s1955_s22]] }
  0x77   : > { %2785 = sst [smem:[#allocation46_spill]] %s2266_s20  ;;  %s124_s7 = ssub.s32 1, %s2151_s5 }
  0x78   : > { %s2861_s12 = smov (!%p2786_p0, %s1415_s12), [#allocation19]  ;;  %p2787_p8 = pmov %p2786_p0 }
  0x79   : > { %s2279_s9 = sld [smem:[#allocation4 + %s2853_s27]]  ;;  %s2281_s11 = sadd.s32 %s124_s7, %s123_s14 }
  0x7a   : > { %s2863_s6 = smov (!%p2787_p8, %s1416_s6), 0  ;;  %s2788_s29 = sld [smem:[#allocation47_spill]] }
  0x7b   : > { %s227_s13 = sld [smem:[%s2861_s12 + %s2863_s6]]  ;;  %s127_s26 = ssub.s32 %s2155_s2, %s2281_s11 }
  0x7c   : > { %s2290_s20 = scalar_lea.sflag [#allocation8], %s222_s15  ;;  %p1727_p6 = pneg %p2260_p10 }
  0x80   : > { %s1730_s6 = scalar_lea.hbm %s2788_s29, 24576 }
  0x81   : > { %s1325_s25 = sshll.u32 %s227_s13, 11 }
  0x82   : > { %s2286_s4 = scalar_lea.hbm %s2788_s29, %s1325_s25 }
  0x83   : > { %s1725_s12 = scalar_lea.hbm %s2286_s4, 2048  ;;  %p1731_p2 = scmp.lt.s32.totalorder %s2286_s4, %s2788_s29 }
  0x84   : > { %p1726_p9 = scmp.ne.s32.totalorder %s2286_s4, %s1725_s12  ;;  %p1732_p7 = scmp.lt.s32.totalorder %s1730_s6, %s1725_s12 }
  0x86   : > { %p1728_p12 = pnand %p1727_p6, %p1726_p9  ;;  %p1733_p13 = por %p1732_p7, %p1731_p2 }
  0x88   : > { %p1729_p1 = pneg %p1728_p12 }
  0x8a   : > { %p1734_p3 = pnand %p1733_p13, %p1729_p1 }
  0x8c   : > { %1737 = shalt.err (!%p1734_p3)
}
  0x8d   : > { %s1738_s15 = scalar_lea.vmem %s2272_s0, 2048  ;;  %s1967_s25 = smov [#allocation7]  }
  0x8e   : > { %p1739_p5 = scmp.ne.s32.totalorder %s2272_s0, %s1738_s15  ;;  %s1743_s1 = sshll.u32 %s1967_s25, 4  ;;  %s1744_s1 = int_to_ptr.vmem [resolvable:$false] %s1743_s1 }
  0x8f   : > { %s1745_s16 = scalar_lea.vmem %s1744_s1, 4096  ;;  %p1746_p8 = scmp.lt.s32.totalorder %s2272_s0, %s1744_s1 }
  0x90   : > { %p1741_p11 = pnand %p1739_p5, %p1727_p6  ;;  %p1747_p9 = scmp.lt.s32.totalorder %s1745_s16, %s1738_s15 }
  0x92   : > { %p1742_p0 = pneg %p1741_p11  ;;  %p1748_p12 = por %p1747_p9, %p1746_p8 }
  0x94   : > { %p1749_p4 = pnand %p1748_p12, %p1742_p0 }
  0x96   : > { %1752 = shalt.err (!%p1749_p4)
}
  0x97   : > { %s2742_s12 = smov 128   ;;  %s2789_s5 = sld [smem:[#allocation32_spill]] }
  0x98   : > { %s2790_s14 = sld [smem:[#allocation33_spill]]  ;;  %s2743_s13 = smov 8  }
  0x99   : > { %s2791_s6 = sld [smem:[#allocation31_spill]]  ;;  %s126_s15 = ssub.s32 %s2275_s28, %s2279_s9 }
  0x9a   : > { %1438 = dma.hbm_to_vmem [thread:$0]  (!%p2260_p10), %s2286_s4, 2048, %s2272_s0, %s2290_s20, %s2742_s12, %s2742_s12, %s2743_s13  }
  0x9b   : > { %p2792_p1 = scmp.eq.s32.totalorder %s1959_s23, 0  ;;  %s128_s30 = sor.u32 %s127_s26, %s126_s15 }
  0x9c   : > { %p2794_p7 = scmp.eq.s32.totalorder %s2112_s24, 0  ;;  %p129_p10 = scmp.eq.s32.totalorder %s128_s30, 0 }
  0x9d   : > { %p2797_p3 = scmp.lt.s32.totalorder %s1959_s23, 24 }
  0x9e   : > { %p138_p4 = scmp.ne.s32.totalorder %s2790_s14, %s2789_s5  ;;  %s131_s7 = sadd.s32 1, %s2790_s14 }
  0x9f   : > { %p144_p6 = scmp.ne.s32.totalorder %s2789_s5, %s2791_s6  ;;  %s274_s0 = sand.u32 1, %s2790_s14  }
  0xa0   : > { %p2323_p2 = por %p138_p4, %p2792_p1  ;;  %s2865_s14 = smov (!%p129_p10, %s2790_s14), %s131_s7 }
  0xa1   : > { %p2332_p13 = por %p144_p6, %p2794_p7  ;;  %p2799_p11 = pmov %p2797_p3 }
  0xa2   : > { %p2341_p5 = pnand %p2797_p3, %p2323_p2  ;;  %p2800_p0 = pmov %p2797_p3 }
  0xa3   : > { %s2795_s4 = scalar_select %p2332_p13, 1, 0 }
  0xa4   : > { %s1423_s2 = scalar_select %p2323_p2, [#allocation5], [#allocation17] }
  0xa5   : > { %2796 = sst [smem:[#allocation31_spill]] %s2795_s4  ;;  %s1290_s9 = sshll.u32 %s274_s0, 7 }
  0xa6   : > { %s1424_s28 = scalar_select %p2323_p2, %s1955_s22, 0 }
  0xa7   : > { %s2867_s2 = smov (!%p2799_p11, %s1423_s2), [#allocation22]  ;;  %p2801_p8 = pmov %p2800_p0 }
  0xa8   : > { %s2869_s28 = smov (!%p2800_p0, %s1424_s28), 0  ;;  %s276_s6 = scalar_lea.vmem [#allocation12], %s1290_s9 }
  0xa9   : > { %s1425_s26 = scalar_select %p2323_p2, [#allocation4], [#allocation18] }
  0xaa   : > { %s277_s11 = sld [smem:[%s2867_s2 + %s2869_s28]]  ;;  %s290_s7 = sshll.u32 %s276_s6, 4  ;;  %s2362_s7 = int_to_ptr.vmem [resolvable:$true] %s290_s7 }
  0xab   : > { %s2871_s26 = smov (!%p2801_p8, %s1425_s26), [#allocation23]  ;;  %s2802_s22 = sld [smem:[#allocation49_spill]] }
  0xac   : > { %s278_s1 = sld [smem:[%s2871_s26 + %s2869_s28]]  ;;  %p1755_p12 = pneg %p2341_p5 }
  0xb0   : > { %s279_s16 = smul.u32 %s1951_s21, %s277_s11  ;;  %s280_s5 = ssub.s32 1, %s277_s11 }
  0xb1   : > { %s2803_s4 = smov %s2802_s22 }
  0xb2   : > { %s281_s15 = sadd.s32 %s280_s5, %s279_s16  ;;  %s1292_s12 = sshll.u32 %s278_s1, 5 }
  0xb3   : > { %s1291_s30 = sshll.u32 %s281_s15, 4 }
  0xb4   : > { %s287_s13 = sadd.s32 %s1292_s12, %s1291_s30  ;;  %s1758_s12 = scalar_lea.hbm %s2803_s4, 32768 }
  0xb5   : > { %s1293_s29 = sshll.u32 %s287_s13, 7 }
  0xb6   : > { %s2367_s0 = scalar_lea.hbm %s2802_s22, %s1293_s29 }
  0xb7   : > { %s1753_s2 = scalar_lea.hbm %s2367_s0, 2048  ;;  %p1759_p1 = scmp.lt.s32.totalorder %s2367_s0, %s2803_s4 }
  0xb8   : > { %p1754_p9 = scmp.ne.s32.totalorder %s2367_s0, %s1753_s2  ;;  %p1760_p2 = scmp.lt.s32.totalorder %s1758_s12, %s1753_s2 }
  0xba   : > { %p1756_p4 = pnand %p1755_p12, %p1754_p9  ;;  %p1761_p7 = por %p1760_p2, %p1759_p1 }
  0xbc   : > { %p1757_p6 = pneg %p1756_p4 }
  0xbe   : > { %p1762_p10 = pnand %p1761_p7, %p1757_p6 }
  0xc0   : > { %1765 = shalt.err (!%p1762_p10)
}
  0xc1   : > { %s1766_s22 = scalar_lea.vmem %s2362_s7, 2048  ;;  %s1970_s27 = smov [#allocation12]  }
  0xc2   : > { %p1767_p3 = scmp.ne.s32.totalorder %s2362_s7, %s1766_s22  ;;  %s1771_s29 = sshll.u32 %s1970_s27, 4  ;;  %s1772_s29 = int_to_ptr.vmem [resolvable:$false] %s1771_s29 }
  0xc3   : > { %s1773_s11 = scalar_lea.vmem %s1772_s29, 4096  ;;  %p1774_p8 = scmp.lt.s32.totalorder %s2362_s7, %s1772_s29 }
  0xc4   : > { %p1769_p11 = pnand %p1767_p3, %p1755_p12  ;;  %p1775_p9 = scmp.lt.s32.totalorder %s1773_s11, %s1766_s22 }
  0xc6   : > { %p1770_p0 = pneg %p1769_p11  ;;  %p1776_p4 = por %p1775_p9, %p1774_p8 }
  0xc8   : > { %p1777_p13 = pnand %p1776_p4, %p1770_p0 }
  0xca   : > { %1780 = shalt.err (!%p1777_p13)
}
  0xcb   : > { %s2804_s1 = smov 8   ;;  %s2805_s16 = smov 128  }
  0xcc   : > { %1452 = dma.hbm_to_vmem [thread:$0]  (!%p2341_p5), %s2367_s0, 2048, %s2362_s7, %s2219_s8, %s2805_s16, %s2805_s16, %s2804_s1  }
  0xcd   : > { %p2806_p12 = scmp.ne.s32.totalorder %s2778_s19, 0 }
  0xce   : > { %s315_s5 = sand.u32 (!%p2806_p12), 1, %s1935_s17   ;;  %p2807_p13 = scmp.ne.s32.totalorder (!%p2806_p12), %s2782_s3, 0 }
  0xcf   : > { %313 = sbr.rel (%p2806_p12) target bundleno = 852 (0x354), region = 36  ;;  %s1295_s6 = sshll.u32 (!%p2806_p12), %s315_s5, 7 }
  0xd0   : > { %s316_s15 = scalar_lea.sflag (!%p2806_p12), [#allocation8], %s315_s5  ;;  %s2394_s30 = scalar_lea.vmem (!%p2806_p12), [#allocation7], %s1295_s6 }
  0xd4   : > { %1878 = dma.done.wait (%p2807_p13), %s316_s15, 2048  }
  0xd5   : > { %1880 = vsyncadd (%p2807_p13), %s316_s15, 4294965248  ;;  %s2808_s20 = sld [smem:[#allocation34_spill]]  ;;  %s324_s2 = sand.u32 1, %s2112_s24  }
  0xd6   : > { %s2809_s25 = sld [smem:[#allocation41_spill]]  ;;  %s325_s19 = scalar_lea.sflag [#allocation11], %s324_s2 }
  0xdb   : > { %s326_s8 = sand.u32 1, %s2808_s20  }
  0xdc   : > { %s1296_s7 = sshll.u32 %s326_s8, 8  ;;  %p2810_p5 = scmp.ne.s32.totalorder %s2809_s25, 0 }
  0xdd   : > { %s2402_s0 = scalar_lea.vmem [#allocation10], %s1296_s7 }
  0xde   : > { %1882 = dma.done.wait (%p2810_p5), %s325_s19, 4096  }
  0xdf   : > { %1884 = vsyncadd (%p2810_p5), %s325_s19, 4294963200  ;;  %s2811_s28 = sld [smem:[#allocation32_spill]] }
  0xe0   : > { %s2812_s26 = sld [smem:[#allocation31_spill]] }
  0xe5   : > { %s335_s12 = sand.u32 1, %s2811_s28  }
  0xe6   : > { %s1297_s9 = sshll.u32 %s335_s12, 7  ;;  %p2813_p6 = scmp.ne.s32.totalorder %s2812_s26, 0 }
  0xe7   : > { %s2409_s3 = scalar_lea.vmem [#allocation12], %s1297_s9 }
  0xe8   : > { %1886 = dma.done.wait (%p2813_p6), %s325_s19, 2048  }
  0xe9   : > { %1888 = vsyncadd (%p2813_p6), %s325_s19, 4294965248  ;;  %s2814_s24 = sld [smem:[#allocation37_spill]]  ;;  %s375_s13 = sand.u32 1, %s1899_s10  }
  0xea   : > { %s1298_s27 = sshll.u32 %s375_s13, 7  ;;  %s2815_s5 = sld [smem:[#allocation50_spill]] }
  0xeb   : > { %s2424_s15 = scalar_lea.vmem [#allocation13], %s1298_s27  ;;  %s2816_s20 = sld [smem:[#allocation36_spill]] }
  0xef   : > { %s390_s22 = sld [smem:[#allocation6 + %s2814_s24]] }
  0xf1   : > { %p1301_p2 = scmp.ne.s32.totalorder %s2816_s20, 0 }
  0xf5   : > { %s1299_s29 = sshll.u32 %s390_s22, 4 }
  0xf6   : > { %p392_p1 = scmp.lt.s32.totalorder %s1299_s29, 191  ;;  %402 = sbr.rel (%p1301_p2) target bundleno = 260 (0x104), region = 52 }
  0xf8   : > { %s2873_s29 = smov (!%p392_p1, %s1299_s29), 191 }
  0xf9   : > { %s1300_s11 = sshll.u32 %s2873_s29, 3 }
  0xfa   : > { %s2422_s6 = scalar_lea.vmem %s2815_s5, %s1300_s11 }
  0xfb   : > { %v1971_v0 = vmov 0.0  }
  0xfc   : > { %403 = vst [vmem:[#allocation2 + $0x30] sm:$0xff] %v1971_v0  ;;  %404 = vst [vmem:[#allocation2] sm:$0xff] %v1971_v0 }
  0xfd   : > { %405 = vst [vmem:[#allocation2 + $0x58] sm:$0xff] %v1971_v0  ;;  %406 = vst [vmem:[#allocation2 + $0x18] sm:$0xff] %v1971_v0 }
  0xfe   : > { %407 = vst [vmem:[#allocation2 + $0x50] sm:$0xff] %v1971_v0  ;;  %408 = vst [vmem:[#allocation2 + $0x68] sm:$0xff] %v1971_v0 }
  0xff   : > { %409 = vst [vmem:[#allocation2 + $0x8] sm:$0xff] %v1971_v0  ;;  %410 = vst [vmem:[#allocation2 + $0x48] sm:$0xff] %v1971_v0 }
 0x100   : > { %411 = vst [vmem:[#allocation2 + $0x40] sm:$0xff] %v1971_v0  ;;  %412 = vst [vmem:[#allocation2 + $0x20] sm:$0xff] %v1971_v0 }
 0x101   : > { %413 = vst [vmem:[#allocation2 + $0x10] sm:$0xff] %v1971_v0  ;;  %414 = vst [vmem:[#allocation2 + $0x38] sm:$0xff] %v1971_v0 }
 0x102   : > { %415 = vst [vmem:[#allocation2 + $0x60] sm:$0xff] %v1971_v0  ;;  %416 = vst [vmem:[#allocation2 + $0x70] sm:$0xff] %v1971_v0 }
 0x103   : > { %417 = vst [vmem:[#allocation2 + $0x78] sm:$0xff] %v1971_v0  ;;  %418 = vst [vmem:[#allocation2 + $0x28] sm:$0xff] %v1971_v0 }
 0x104 PF: > { %s2817_s25 = sld [smem:[#allocation37_spill]] }
 0x10a   : > { %s419_s2 = sld [smem:[#allocation5 + %s2817_s25]] }
 0x110   : > { %p1302_p7 = scmp.eq.s32.totalorder %s419_s2, 0 }
 0x112   : > { %423 = sbr.rel (%p1302_p7) target bundleno = 802 (0x322), region = 56 }
 0x117   : > { %v471_v1 = vld [vmem:[%s2402_s0 + $0xf8] sm:$0xff]  ;;  %v470_v2 = vld [vmem:[%s2402_s0 + $0xf0] sm:$0xff]  ;;  %v469_v3 = vld [vmem:[%s2402_s0 + $0xe8] sm:$0xff]  ;;  %v1972_v5 = vmov 0.0  }
 0x118   : > { %472 = vmatprep.subr.mxu0 %v471_v1  ;;  %v468_v4 = vld [vmem:[%s2402_s0 + $0xe0] sm:$0xff]  ;;  %536 = vmatprep.mubr.f32.mxu0 %v1972_v5  ;;  %v467_v6 = vld [vmem:[%s2402_s0 + $0xd8] sm:$0xff]  ;;  %v466_v7 = vld [vmem:[%s2402_s0 + $0xd0] sm:$0xff] }
 0x119   : > { %473 = vmatpush1.msra.mxu0 %v470_v2  ;;  %v465_v8 = vld [vmem:[%s2402_s0 + $0xc8] sm:$0xff]  ;;  %v464_v9 = vld [vmem:[%s2402_s0 + $0xc0] sm:$0xff]  ;;  %v463_v10 = vld [vmem:[%s2402_s0 + $0xb8] sm:$0xff] }
 0x11a   : > { %474 = vmatprep.subr.mxu0 %v469_v3  ;;  %v462_v11 = vld [vmem:[%s2402_s0 + $0xb0] sm:$0xff]  ;;  %v461_v12 = vld [vmem:[%s2402_s0 + $0xa8] sm:$0xff]  ;;  %v460_v13 = vld [vmem:[%s2402_s0 + $0xa0] sm:$0xff] }
 0x11b   : > { %475 = vmatpush1.msra.mxu0 %v468_v4  ;;  %v459_v14 = vld [vmem:[%s2402_s0 + $0x98] sm:$0xff]  ;;  %v458_v15 = vld [vmem:[%s2402_s0 + $0x90] sm:$0xff]  ;;  %v457_v16 = vld [vmem:[%s2402_s0 + $0x88] sm:$0xff]  ;;  %v1973_v4 = vmov 0  }
 0x11c   : > { %476 = vmatprep.subr.mxu0 %v467_v6  ;;  %v456_v17 = vld [vmem:[%s2402_s0 + $0x80] sm:$0xff]  ;;  %v455_v18 = vld [vmem:[%s2402_s0 + $0x78] sm:$0xff]  ;;  %v454_v19 = vld [vmem:[%s2402_s0 + $0x70] sm:$0xff]  ;;  %1607 = vset.pattern.permute.xlu0 %v1973_v4 }
 0x11d   : > { %477 = vmatpush1.msra.mxu0 %v466_v7  ;;  %v453_v20 = vld [vmem:[%s2402_s0 + $0x68] sm:$0xff]  ;;  %v452_v21 = vld [vmem:[%s2402_s0 + $0x60] sm:$0xff]  ;;  %v451_v22 = vld [vmem:[%s2402_s0 + $0x58] sm:$0xff]  ;;  %1608 = vset.pattern.permute.xlu1 %v1973_v4 }
 0x11e   : > { %478 = vmatprep.subr.mxu0 %v465_v8  ;;  %v450_v23 = vld [vmem:[%s2402_s0 + $0x50] sm:$0xff]  ;;  %v449_v24 = vld [vmem:[%s2402_s0 + $0x48] sm:$0xff]  ;;  %v448_v25 = vld [vmem:[%s2402_s0 + $0x40] sm:$0xff] }
 0x11f   : > { %479 = vmatpush1.msra.mxu0 %v464_v9  ;;  %v447_v26 = vld [vmem:[%s2402_s0 + $0x38] sm:$0xff]  ;;  %v446_v27 = vld [vmem:[%s2402_s0 + $0x30] sm:$0xff]  ;;  %v445_v28 = vld [vmem:[%s2402_s0 + $0x28] sm:$0xff] }
 0x120   : > { %480 = vmatprep.subr.mxu0 %v463_v10  ;;  %v444_v29 = vld [vmem:[%s2402_s0 + $0x20] sm:$0xff]  ;;  %v443_v30 = vld [vmem:[%s2402_s0 + $0x18] sm:$0xff]  ;;  %v442_v31 = vld [vmem:[%s2402_s0 + $0x10] sm:$0xff] }
 0x121   : > { %481 = vmatpush1.msra.mxu0 %v462_v11  ;;  %v441_v32 = vld [vmem:[%s2402_s0 + $0x8] sm:$0xff]  ;;  %v440_v33 = vld [vmem:[%s2402_s0] sm:$0xff]  ;;  %v426_v36 = vld [vmem:[%s2394_s30 + $0x10] sm:$0xff] }
 0x122   : > { %482 = vmatprep.subr.mxu0 %v461_v12  ;;  %v424_v34 = vld [vmem:[%s2394_s30] sm:$0xff]  ;;  %v425_v35 = vld [vmem:[%s2394_s30 + $0x8] sm:$0xff]  ;;  %v427_v37 = vld [vmem:[%s2394_s30 + $0x18] sm:$0xff] }
 0x123   : > { %483 = vmatpush1.msra.mxu0 %v460_v13  ;;  %v428_v38 = vld [vmem:[%s2394_s30 + $0x20] sm:$0xff]  ;;  %v429_v39 = vld [vmem:[%s2394_s30 + $0x28] sm:$0xff]  ;;  %v430_v40 = vld [vmem:[%s2394_s30 + $0x30] sm:$0xff] }
 0x124   : > { %484 = vmatprep.subr.mxu0 %v459_v14  ;;  %v431_v41 = vld [vmem:[%s2394_s30 + $0x38] sm:$0xff]  ;;  %v432_v42 = vld [vmem:[%s2394_s30 + $0x40] sm:$0xff]  ;;  %v433_v43 = vld [vmem:[%s2394_s30 + $0x48] sm:$0xff] }
 0x125   : > { %485 = vmatpush1.msra.mxu0 %v458_v15  ;;  %v434_v44 = vld [vmem:[%s2394_s30 + $0x50] sm:$0xff]  ;;  %v435_v45 = vld [vmem:[%s2394_s30 + $0x58] sm:$0xff]  ;;  %v436_v46 = vld [vmem:[%s2394_s30 + $0x60] sm:$0xff] }
 0x126   : > { %486 = vmatprep.subr.mxu0 %v457_v16  ;;  %v437_v47 = vld [vmem:[%s2394_s30 + $0x68] sm:$0xff]  ;;  %v438_v48 = vld [vmem:[%s2394_s30 + $0x70] sm:$0xff]  ;;  %v439_v49 = vld [vmem:[%s2394_s30 + $0x78] sm:$0xff] }
 0x127   : > { %487 = vmatpush1.msra.mxu0 %v456_v17  ;;  %v808_v50 = vld [vmem:[%s2409_s3 + $0x78] sm:$0xff]  ;;  %v807_v51 = vld [vmem:[%s2409_s3 + $0x70] sm:$0xff]  ;;  %v806_v52 = vld [vmem:[%s2409_s3 + $0x68] sm:$0xff] }
 0x128   : > { %488 = vmatprep.subr.mxu0 %v455_v18  ;;  %1359 = vmatprep.subr.mxu1 %v808_v50  ;;  %v805_v53 = vld [vmem:[%s2409_s3 + $0x60] sm:$0xff]  ;;  %v804_v54 = vld [vmem:[%s2409_s3 + $0x58] sm:$0xff]  ;;  %v803_v55 = vld [vmem:[%s2409_s3 + $0x50] sm:$0xff] }
 0x129   : > { %489 = vmatpush1.msra.mxu0 %v454_v19  ;;  %1360 = vmatpush3.msra.mxu1 %v808_v50  ;;  %v802_v56 = vld [vmem:[%s2409_s3 + $0x48] sm:$0xff]  ;;  %v801_v57 = vld [vmem:[%s2409_s3 + $0x40] sm:$0xff]  ;;  %v800_v58 = vld [vmem:[%s2409_s3 + $0x38] sm:$0xff] }
 0x12a   : > { %490 = vmatprep.subr.mxu0 %v453_v20  ;;  %1361 = vmatprep.subr.mxu1 %v807_v51  ;;  %v799_v59 = vld [vmem:[%s2409_s3 + $0x30] sm:$0xff]  ;;  %v798_v60 = vld [vmem:[%s2409_s3 + $0x28] sm:$0xff]  ;;  %v797_v61 = vld [vmem:[%s2409_s3 + $0x20] sm:$0xff] }
 0x12b   : > { %491 = vmatpush1.msra.mxu0 %v452_v21  ;;  %1362 = vmatpush3.msra.mxu1 %v807_v51  ;;  %v796_v62 = vld [vmem:[%s2409_s3 + $0x18] sm:$0xff]  ;;  %v795_v63 = vld [vmem:[%s2409_s3 + $0x10] sm:$0xff]  ;;  %v794_v0 = vld [vmem:[%s2409_s3 + $0x8] sm:$0xff] }
 0x12c   : > { %492 = vmatprep.subr.mxu0 %v451_v22  ;;  %1363 = vmatprep.subr.mxu1 %v806_v52  ;;  %v793_v1 = vld [vmem:[%s2409_s3] sm:$0xff]  ;;  %v779_v3 = vld [vmem:[%s2422_s6 + $0x10] sm:$0xff]  ;;  %v780_v6 = vld [vmem:[%s2422_s6 + $0x18] sm:$0xff] }
 0x12d   : > { %493 = vmatpush1.msra.mxu0 %v450_v23  ;;  %1364 = vmatpush3.msra.mxu1 %v806_v52  ;;  %v777_v2 = vld [vmem:[%s2422_s6] sm:$0xff]  ;;  %v782_v7 = vld [vmem:[%s2422_s6 + $0x28] sm:$0xff]  ;;  %v784_v9 = vld [vmem:[%s2422_s6 + $0x38] sm:$0xff] }
 0x12e   : > { %494 = vmatprep.subr.mxu0 %v449_v24  ;;  %1365 = vmatprep.subr.mxu1 %v805_v53  ;;  %v781_v8 = vld [vmem:[%s2422_s6 + $0x20] sm:$0xff]  ;;  %v783_v10 = vld [vmem:[%s2422_s6 + $0x30] sm:$0xff]  ;;  %v786_v11 = vld [vmem:[%s2422_s6 + $0x48] sm:$0xff] }
 0x12f   : > { %495 = vmatpush1.msra.mxu0 %v448_v25  ;;  %1366 = vmatpush3.msra.mxu1 %v805_v53  ;;  %v785_v12 = vld [vmem:[%s2422_s6 + $0x40] sm:$0xff]  ;;  %v788_v13 = vld [vmem:[%s2422_s6 + $0x58] sm:$0xff]  ;;  %v787_v14 = vld [vmem:[%s2422_s6 + $0x50] sm:$0xff] }
 0x130   : > { %496 = vmatprep.subr.mxu0 %v447_v26  ;;  %1367 = vmatprep.subr.mxu1 %v804_v54  ;;  %v790_v15 = vld [vmem:[%s2422_s6 + $0x68] sm:$0xff]  ;;  %v789_v16 = vld [vmem:[%s2422_s6 + $0x60] sm:$0xff]  ;;  %v792_v17 = vld [vmem:[%s2422_s6 + $0x78] sm:$0xff] }
 0x131   : > { %497 = vmatpush1.msra.mxu0 %v446_v27  ;;  %1368 = vmatpush3.msra.mxu1 %v804_v54  ;;  %v791_v18 = vld [vmem:[%s2422_s6 + $0x70] sm:$0xff] }
 0x132   : > { %498 = vmatprep.subr.mxu0 %v445_v28  ;;  %1369 = vmatprep.subr.mxu1 %v803_v55 }
 0x133   : > { %499 = vmatpush1.msra.mxu0 %v444_v29  ;;  %1370 = vmatpush3.msra.mxu1 %v803_v55 }
 0x134   : > { %500 = vmatprep.subr.mxu0 %v443_v30  ;;  %1371 = vmatprep.subr.mxu1 %v802_v56 }
 0x135   : > { %501 = vmatpush1.msra.mxu0 %v442_v31  ;;  %1372 = vmatpush3.msra.mxu1 %v802_v56 }
 0x136   : > { %502 = vmatprep.subr.mxu0 %v441_v32  ;;  %1373 = vmatprep.subr.mxu1 %v801_v57 }
 0x137   : > { %503 = vmatpush1.msra.mxu0 %v440_v33  ;;  %1374 = vmatpush3.msra.mxu1 %v801_v57 }
 0x138   : > { %537 = vmatmul.mubr.f32.vlgmr.msra.gmra.mxu0 %v424_v34  ;;  %1375 = vmatprep.subr.mxu1 %v800_v58 }
 0x139   : > { %542 = vmatprep.mubr.f32.mxu0 %v1972_v5  ;;  %1376 = vmatpush3.msra.mxu1 %v800_v58 }
 0x13a   : > { %1377 = vmatprep.subr.mxu1 %v799_v59  ;;  %956 = vperm.xlu0 %1607, %v777_v2  }
 0x13b   : > { %1378 = vmatpush3.msra.mxu1 %v799_v59  ;;  %966 = vperm.xlu1 %1608, %v779_v3  }
 0x13c   : > { %543 = vmatmul.mubr.f32.gmra.mxu0 %v425_v35  ;;  %1379 = vmatprep.subr.mxu1 %v798_v60 }
 0x13d   : > { %548 = vmatprep.mubr.f32.mxu0 %v1972_v5  ;;  %1380 = vmatpush3.msra.mxu1 %v798_v60 }
 0x13e   : > { %1381 = vmatprep.subr.mxu1 %v797_v61 }
 0x13f   : > { %1382 = vmatpush3.msra.mxu1 %v797_v61  ;;  %971 = vperm.xlu1 %1608, %v780_v6  }
 0x140   : > { %549 = vmatmul.mubr.f32.gmra.mxu0 %v426_v36  ;;  %1383 = vmatprep.subr.mxu1 %v796_v62 }
 0x141   : > { %554 = vmatprep.mubr.f32.mxu0 %v1972_v5  ;;  %1384 = vmatpush3.msra.mxu1 %v796_v62 }
 0x142   : > { %1385 = vmatprep.subr.mxu1 %v795_v63 }
 0x143   : > { %1386 = vmatpush3.msra.mxu1 %v795_v63  ;;  %981 = vperm.xlu1 %1608, %v782_v7  }
 0x144   : > { %555 = vmatmul.mubr.f32.gmra.mxu0 %v427_v37  ;;  %1387 = vmatprep.subr.mxu1 %v794_v0 }
 0x145   : > { %560 = vmatprep.mubr.f32.mxu0 %v1972_v5  ;;  %1388 = vmatpush3.msra.mxu1 %v794_v0 }
 0x146   : > { %1389 = vmatprep.subr.mxu1 %v793_v1 }
 0x147   : > { %1390 = vmatpush3.msra.mxu1 %v793_v1  ;;  %991 = vperm.xlu1 %1608, %v784_v9  }
 0x148   : > { %561 = vmatmul.mubr.f32.gmra.mxu0 %v428_v38 }
 0x149   : > { %566 = vmatprep.mubr.f32.mxu0 %v1972_v5 }
 0x14b   : > { %1001 = vperm.xlu1 %1608, %v786_v11  }
 0x14c   : > { %567 = vmatmul.mubr.f32.gmra.mxu0 %v429_v39 }
 0x14d   : > { %572 = vmatprep.mubr.f32.mxu0 %v1972_v5 }
 0x14f   : > { %1011 = vperm.xlu1 %1608, %v788_v13  }
 0x150   : > { %573 = vmatmul.mubr.f32.gmra.mxu0 %v430_v40 }
 0x151   : > { %578 = vmatprep.mubr.f32.mxu0 %v1972_v5 }
 0x153   : > { %1021 = vperm.xlu1 %1608, %v790_v15  }
 0x154   : > { %579 = vmatmul.mubr.f32.gmra.mxu0 %v431_v41 }
 0x155   : > { %584 = vmatprep.mubr.f32.mxu0 %v1972_v5 }
 0x157   : > { %1031 = vperm.xlu1 %1608, %v792_v17  }
 0x158   : > { %585 = vmatmul.mubr.f32.gmra.mxu0 %v432_v42 }
 0x159   : > { %590 = vmatprep.mubr.f32.mxu0 %v1972_v5 }
 0x15c   : > { %591 = vmatmul.mubr.f32.gmra.mxu0 %v433_v43 }
 0x15d   : > { %596 = vmatprep.mubr.f32.mxu0 %v1972_v5 }
 0x160   : > { %597 = vmatmul.mubr.f32.gmra.mxu0 %v434_v44 }
 0x161   : > { %602 = vmatprep.mubr.f32.mxu0 %v1972_v5 }
 0x164   : > { %603 = vmatmul.mubr.f32.gmra.mxu0 %v435_v45 }
 0x165   : > { %608 = vmatprep.mubr.f32.mxu0 %v1972_v5 }
 0x168   : > { %609 = vmatmul.mubr.f32.gmra.mxu0 %v436_v46 }
 0x169   : > { %614 = vmatprep.mubr.f32.mxu0 %v1972_v5 }
 0x16c   : > { %615 = vmatmul.mubr.f32.gmra.mxu0 %v437_v47 }
 0x16d   : > { %620 = vmatprep.mubr.f32.mxu0 %v1972_v5 }
 0x170   : > { %621 = vmatmul.mubr.f32.gmra.mxu0 %v438_v48 }
 0x171   : > { %626 = vmatprep.mubr.f32.mxu0 %v1972_v5  ;;  %v778_v5 = vld [vmem:[%s2422_s6 + $0x8] sm:$0xff] }
 0x172   : > { %961 = vperm.xlu0 %1607, %v778_v5  }
 0x174   : > { %627 = vmatmul.mubr.f32.gmra.mxu0 %v439_v49 }
 0x176   : > { %976 = vperm.xlu0 %1607, %v781_v8  }
 0x17a   : > { %986 = vperm.xlu0 %1607, %v783_v10  }
 0x17e   : > { %996 = vperm.xlu0 %1607, %v785_v12  }
 0x182   : > { %1006 = vperm.xlu0 %1607, %v787_v14  }
 0x186   : > { %1016 = vperm.xlu0 %1607, %v789_v16  }
 0x18a   : > { %1026 = vperm.xlu0 %1607, %v791_v18  }
 0x1f8   : > { %v538_v19 = vpop.f32.mrf.mxu0 }
 0x1f9   : > { %v1303_v20 = vmul.f32 -1.442695, %v538_v19 }
 0x1fa   : > { %v540_v21 = vpop.f32.mrf.mxu0 }
 0x1fb   : > { %1609 = vpow2.f32 %v1303_v20 }
 0x1fc   : > { %v544_v22 = vpop.f32.mrf.mxu0 }
 0x1fd   : > { %v1304_v23 = vmul.f32 -1.442695, %v544_v22 }
 0x1fe   : > { %v546_v24 = vpop.f32.mrf.mxu0 }
 0x1ff   : > { %1611 = vpow2.f32 %v1304_v23 }
 0x200   : > { %v550_v25 = vpop.f32.mrf.mxu0 }
 0x201   : > { %v1305_v26 = vmul.f32 -1.442695, %v550_v25 }
 0x202   : > { %v2524_v27 = vpop.f32.mrf.mxu0 }
 0x203   : > { %1613 = vpow2.f32 %v1305_v26 }
 0x204   : > { %v2526_v28 = vpop.f32.mrf.mxu0 }
 0x205   : > { %v1306_v29 = vmul.f32 -1.442695, %v2526_v28 }
 0x206   : > { %v2529_v30 = vpop.f32.mrf.mxu0 }
 0x207   : > { %1615 = vpow2.f32 %v1306_v29 }
 0x208   : > { %v1610_v31 = vpop.eup %1609  ;;  %v2531_v32 = vpop.f32.mrf.mxu0 }
 0x209   : > { %v681_v33 = vadd.f32 1.0, %v1610_v31  ;;  %v1307_v34 = vmul.f32 -1.442695, %v2531_v32 }
 0x20a   : > { %v2534_v35 = vpop.f32.mrf.mxu0 }
 0x20b   : > { %1617 = vrcp.f32 %v681_v33 }
 0x20c   : > { %v1612_v36 = vpop.eup %1611  ;;  %1619 = vpow2.f32 %v1307_v34  ;;  %v2536_v37 = vpop.f32.mrf.mxu0 }
 0x20d   : > { %v682_v38 = vadd.f32 1.0, %v1612_v36  ;;  %v1308_v39 = vmul.f32 -1.442695, %v2536_v37 }
 0x20e   : > { %v2539_v40 = vpop.f32.mrf.mxu0 }
 0x20f   : > { %1621 = vrcp.f32 %v682_v38 }
 0x210   : > { %v1614_v41 = vpop.eup %1613  ;;  %1623 = vpow2.f32 %v1308_v39  ;;  %v2541_v42 = vpop.f32.mrf.mxu0 }
 0x211   : > { %v683_v43 = vadd.f32 1.0, %v1614_v41  ;;  %v1309_v44 = vmul.f32 -1.442695, %v2541_v42 }
 0x212   : > { %v2544_v45 = vpop.f32.mrf.mxu0 }
 0x213   : > { %1625 = vrcp.f32 %v683_v43 }
 0x214   : > { %v1616_v46 = vpop.eup %1615  ;;  %1627 = vpow2.f32 %v1309_v44  ;;  %v2546_v47 = vpop.f32.mrf.mxu0 }
 0x215   : > { %v684_v48 = vadd.f32 1.0, %v1616_v46  ;;  %v1310_v49 = vmul.f32 -1.442695, %v2546_v47 }
 0x216   : > { %v2549_v50 = vpop.f32.mrf.mxu0 }
 0x217   : > { %1629 = vrcp.f32 %v684_v48 }
 0x218   : > { %v1618_v51 = vpop.eup %1617  ;;  %1631 = vpow2.f32 %v1310_v49  ;;  %v2551_v52 = vpop.f32.mrf.mxu0 }
 0x219   : > { %v1620_v53 = vpop.eup %1619  ;;  %v729_v54 = vmul.f32 %v1618_v51, %v538_v19  ;;  %v1311_v55 = vmul.f32 -1.442695, %v2551_v52 }
 0x21a   : > { %v685_v56 = vadd.f32 1.0, %v1620_v53  ;;  %v2554_v57 = vpop.f32.mrf.mxu0 }
 0x21b   : > { %1633 = vpow2.f32 %v1311_v55  ;;  %v745_v58 = vmul.f32 %v729_v54, %v540_v21 }
 0x21c   : > { %v1622_v59 = vpop.eup %1621  ;;  %1635 = vrcp.f32 %v685_v56  ;;  %v2556_v60 = vpop.f32.mrf.mxu0 }
 0x21d   : > { %v1624_v61 = vpop.eup %1623  ;;  %v730_v62 = vmul.f32 %v1622_v59, %v544_v22  ;;  %v1312_v63 = vmul.f32 -1.442695, %v2556_v60  ;;  %1391 = vmatprep.mubr.f32.mxu1 %v745_v58 }
 0x21e   : > { %v686_v0 = vadd.f32 1.0, %v1624_v61  ;;  %v2559_v1 = vpop.f32.mrf.mxu0 }
 0x21f   : > { %v746_v2 = vmul.f32 %v730_v62, %v546_v24  ;;  %1637 = vpow2.f32 %v1312_v63 }
 0x220   : > { %v1626_v3 = vpop.eup %1625  ;;  %1639 = vrcp.f32 %v686_v0  ;;  %v2561_v4 = vpop.f32.mrf.mxu0 }
 0x221   : > { %v1628_v5 = vpop.eup %1627  ;;  %v731_v6 = vmul.f32 %v1626_v3, %v550_v25  ;;  %v1313_v7 = vmul.f32 -1.442695, %v2561_v4  ;;  %1392 = vmatmul.mubr.f32.vlgmr.msra.gmra.mxu1 %v746_v2 }
 0x222   : > { %v687_v8 = vadd.f32 1.0, %v1628_v5  ;;  %v2564_v9 = vpop.f32.mrf.mxu0 }
 0x223   : > { %v747_v10 = vmul.f32 %v731_v6, %v2524_v27  ;;  %1641 = vpow2.f32 %v1313_v7 }
 0x224   : > { %v1630_v11 = vpop.eup %1629  ;;  %1643 = vrcp.f32 %v687_v8  ;;  %v2567_v12 = vpop.f32.mrf.mxu0 }
 0x225   : > { %v1632_v13 = vpop.eup %1631  ;;  %v732_v14 = vmul.f32 %v1630_v11, %v2526_v28  ;;  %v1314_v15 = vmul.f32 -1.442695, %v2567_v12  ;;  %1394 = vmatprep.mubr.f32.mxu1 %v747_v10 }
 0x226   : > { %v688_v16 = vadd.f32 1.0, %v1632_v13  ;;  %v2571_v17 = vpop.f32.mrf.mxu0 }
 0x227   : > { %v748_v18 = vmul.f32 %v732_v14, %v2529_v30  ;;  %1645 = vpow2.f32 %v1314_v15 }
 0x228   : > { %v1634_v19 = vpop.eup %1633  ;;  %1647 = vrcp.f32 %v688_v16  ;;  %v2574_v20 = vpop.f32.mrf.mxu0 }
 0x229   : > { %v1636_v21 = vpop.eup %1635  ;;  %v689_v22 = vadd.f32 1.0, %v1634_v19  ;;  %v1315_v23 = vmul.f32 -1.442695, %v2574_v20  ;;  %1395 = vmatmul.mubr.f32.gmra.mxu1 %v748_v18  ;;  %v957_v19 = vpop.permute.xlu0 %956 }
 0x22a   : > { %v733_v24 = vmul.f32 %v1636_v21, %v2531_v32  ;;  %v2578_v25 = vpop.f32.mrf.mxu0 }
 0x22b   : > { %1649 = vrcp.f32 %v689_v22 }
 0x22c   : > { %v1638_v26 = vpop.eup %1637  ;;  %v749_v27 = vmul.f32 %v733_v24, %v2534_v35  ;;  %1651 = vpow2.f32 %v1315_v23  ;;  %v2581_v28 = vpop.f32.mrf.mxu0 }
 0x22d   : > { %v1640_v29 = vpop.eup %1639  ;;  %v690_v30 = vadd.f32 1.0, %v1638_v26  ;;  %v1316_v31 = vmul.f32 -1.442695, %v2581_v28  ;;  %v962_v21 = vpop.permute.xlu0 %961 }
 0x22e   : > { %v734_v33 = vmul.f32 %v1640_v29, %v2536_v37  ;;  %1397 = vmatprep.mubr.f32.mxu1 %v749_v27  ;;  %v618_v34 = vpop.f32.mrf.mxu0  ;;  %v967_v24 = vpop.permute.xlu1 %966 }
 0x22f   : > { %1653 = vrcp.f32 %v690_v30 }
 0x230   : > { %v1642_v36 = vpop.eup %1641  ;;  %v750_v32 = vmul.f32 %v734_v33, %v2539_v40  ;;  %1655 = vpow2.f32 %v1316_v31  ;;  %v622_v38 = vpop.f32.mrf.mxu0  ;;  %v764_v31 = vld [vmem:[#allocation2 + $0x18] sm:$0xff] }
 0x231   : > { %v1644_v39 = vpop.eup %1643  ;;  %v691_v41 = vadd.f32 1.0, %v1642_v36  ;;  %v1317_v35 = vmul.f32 -1.442695, %v622_v38  ;;  %v763_v36 = vld [vmem:[#allocation2 + $0x58] sm:$0xff] }
 0x232   : > { %v735_v43 = vmul.f32 %v1644_v39, %v2541_v42  ;;  %1398 = vmatmul.mubr.f32.gmra.mxu1 %v750_v32  ;;  %v624_v44 = vpop.f32.mrf.mxu0  ;;  %v972_v30 = vpop.permute.xlu1 %971 }
 0x233   : > { %1657 = vrcp.f32 %v691_v41 }
 0x234   : > { %v1646_v46 = vpop.eup %1645  ;;  %v751_v48 = vmul.f32 %v735_v43, %v2544_v45  ;;  %1659 = vpow2.f32 %v1317_v35  ;;  %v628_v37 = vpop.f32.mrf.mxu0  ;;  %v766_v43 = vld [vmem:[#allocation2 + $0x68] sm:$0xff] }
 0x235   : > { %v1648_v49 = vpop.eup %1647  ;;  %v692_v51 = vadd.f32 1.0, %v1646_v46  ;;  %v1318_v53 = vmul.f32 -1.442695, %v628_v37 }
 0x236   : > { %v736_v40 = vmul.f32 %v1648_v49, %v2546_v47  ;;  %1400 = vmatprep.mubr.f32.mxu1 %v751_v48  ;;  %v982_v35 = vpop.permute.xlu1 %981  ;;  %v977_v48 = vpop.permute.xlu0 %976 }
 0x237   : > { %1661 = vrcp.f32 %v692_v51 }
 0x238   : > { %v1650_v54 = vpop.eup %1649  ;;  %v752_v55 = vmul.f32 %v736_v40, %v2549_v50  ;;  %1663 = vpow2.f32 %v1318_v53 }
 0x239   : > { %v1652_v42 = vpop.eup %1651  ;;  %v737_v56 = vmul.f32 %v1650_v54, %v2551_v52 }
 0x23a   : > { %v693_v58 = vadd.f32 1.0, %v1652_v42  ;;  %1401 = vmatmul.mubr.f32.gmra.mxu1 %v752_v55  ;;  %v992_v54 = vpop.permute.xlu1 %991  ;;  %v768_v55 = vld [vmem:[#allocation2 + $0x48] sm:$0xff] }
 0x23b   : > { %v753_v45 = vmul.f32 %v737_v56, %v2554_v57 }
 0x23c   : > { %v1654_v59 = vpop.eup %1653  ;;  %1665 = vrcp.f32 %v693_v58  ;;  %v987_v58 = vpop.permute.xlu0 %986 }
 0x23d   : > { %v1656_v61 = vpop.eup %1655  ;;  %v738_v62 = vmul.f32 %v1654_v59, %v2556_v60  ;;  %1403 = vmatprep.mubr.f32.mxu1 %v753_v45  ;;  %v767_v45 = vld [vmem:[#allocation2 + $0x8] sm:$0xff] }
 0x23e   : > { %v694_v47 = vadd.f32 1.0, %v1656_v61 }
 0x23f   : > { %v754_v63 = vmul.f32 %v738_v62, %v2559_v1 }
 0x240   : > { %v1658_v0 = vpop.eup %1657  ;;  %1667 = vrcp.f32 %v694_v47 }
 0x241   : > { %v1660_v50 = vpop.eup %1659  ;;  %v739_v2 = vmul.f32 %v1658_v0, %v2561_v4  ;;  %1404 = vmatmul.mubr.f32.gmra.mxu1 %v754_v63  ;;  %v1002_v63 = vpop.permute.xlu1 %1001  ;;  %v770_v0 = vld [vmem:[#allocation2 + $0x20] sm:$0xff] }
 0x242   : > { %v695_v52 = vadd.f32 1.0, %v1660_v50 }
 0x243   : > { %v755_v3 = vmul.f32 %v739_v2, %v2564_v9 }
 0x244   : > { %v1662_v5 = vpop.eup %1661  ;;  %1669 = vrcp.f32 %v695_v52  ;;  %v997_v52 = vpop.permute.xlu0 %996 }
 0x245   : > { %v1664_v57 = vpop.eup %1663  ;;  %v740_v6 = vmul.f32 %v1662_v5, %v2567_v12  ;;  %1406 = vmatprep.mubr.f32.mxu1 %v755_v3  ;;  %v769_v3 = vld [vmem:[#allocation2 + $0x40] sm:$0xff] }
 0x246   : > { %v696_v60 = vadd.f32 1.0, %v1664_v57 }
 0x247   : > { %v756_v7 = vmul.f32 %v740_v6, %v2571_v17  ;;  %v630_v17 = vpop.f32.mrf.mxu0 }
 0x248   : > { %1671 = vrcp.f32 %v696_v60 }
 0x249   : > { %v1666_v1 = vpop.eup %1665  ;;  %1407 = vmatmul.mubr.f32.gmra.mxu1 %v756_v7  ;;  %v1012_v7 = vpop.permute.xlu1 %1011 }
 0x24a   : > { %v741_v8 = vmul.f32 %v1666_v1, %v2574_v20  ;;  %v762_v20 = vld [vmem:[#allocation2] sm:$0xff]  ;;  %v772_v1 = vld [vmem:[#allocation2 + $0x38] sm:$0xff] }
 0x24c   : > { %v757_v4 = vmul.f32 %v741_v8, %v2578_v25  ;;  %v761_v25 = vld [vmem:[#allocation2 + $0x30] sm:$0xff] }
 0x24d   : > { %v1668_v10 = vpop.eup %1667 }
 0x24e   : > { %v742_v11 = vmul.f32 %v1668_v10, %v2581_v28  ;;  %1409 = vmatprep.mubr.f32.mxu1 %v757_v4  ;;  %v1007_v10 = vpop.permute.xlu0 %1006 }
 0x250   : > { %v758_v9 = vmul.f32 %v742_v11, %v618_v34  ;;  %v771_v11 = vld [vmem:[#allocation2 + $0x10] sm:$0xff] }
 0x251   : > { %v1670_v13 = vpop.eup %1669 }
 0x252   : > { %v743_v14 = vmul.f32 %v1670_v13, %v622_v38  ;;  %1410 = vmatmul.mubr.f32.gmra.mxu1 %v758_v9 }
 0x254   : > { %v759_v12 = vmul.f32 %v743_v14, %v624_v44 }
 0x255   : > { %v1672_v15 = vpop.eup %1671 }
 0x256   : > { %v744_v16 = vmul.f32 %v1672_v15, %v628_v37  ;;  %1412 = vmatprep.mubr.f32.mxu1 %v759_v12  ;;  %v765_v37 = vld [vmem:[#allocation2 + $0x50] sm:$0xff]  ;;  %v1022_v15 = vpop.permute.xlu1 %1021 }
 0x258   : > { %v760_v18 = vmul.f32 %v744_v16, %v630_v17  ;;  %v774_v16 = vld [vmem:[#allocation2 + $0x70] sm:$0xff] }
 0x25a   : > { %1413 = vmatmul.mubr.f32.gmra.mxu1 %v760_v18 }
 0x2e1   : > { %v1393_v22 = vpop.f32.mrf.mxu1 }
 0x2e2   : > { %v1035_v23 = vmul.f32 %v1393_v22, %v962_v21  ;;  %v773_v21 = vld [vmem:[#allocation2 + $0x60] sm:$0xff] }
 0x2e3   : > { %v875_v26 = vpop.f32.mrf.mxu1 }
 0x2e4   : > { %v1051_v27 = vadd.f32 %v1035_v23, %v762_v20  ;;  %v1034_v28 = vmul.f32 %v957_v19, %v875_v26  ;;  %v1017_v19 = vpop.permute.xlu0 %1016  ;;  %v776_v26 = vld [vmem:[#allocation2 + $0x28] sm:$0xff] }
 0x2e6   : > { %1067 = vst [vmem:[#allocation2] sm:$0xff] %v1051_v27  ;;  %v1050_v29 = vadd.f32 %v1034_v28, %v761_v25  ;;  %v1032_v25 = vpop.permute.xlu1 %1031 }
 0x2e8   : > { %1066 = vst [vmem:[#allocation2 + $0x30] sm:$0xff] %v1050_v29  ;;  %v1027_v29 = vpop.permute.xlu0 %1026 }
 0x2e9   : > { %v1396_v33 = vpop.f32.mrf.mxu1 }
 0x2ea   : > { %v1037_v34 = vmul.f32 %v1396_v33, %v972_v30  ;;  %v775_v30 = vld [vmem:[#allocation2 + $0x78] sm:$0xff] }
 0x2eb   : > { %v885_v32 = vpop.f32.mrf.mxu1 }
 0x2ec   : > { %v1053_v38 = vadd.f32 %v1037_v34, %v764_v31  ;;  %v1036_v39 = vmul.f32 %v967_v24, %v885_v32 }
 0x2ee   : > { %1069 = vst [vmem:[#allocation2 + $0x18] sm:$0xff] %v1053_v38  ;;  %v1052_v41 = vadd.f32 %v1036_v39, %v763_v36 }
 0x2f0   : > { %1068 = vst [vmem:[#allocation2 + $0x58] sm:$0xff] %v1052_v41 }
 0x2f2   : > { %v1399_v44 = vpop.f32.mrf.mxu1 }
 0x2f3   : > { %v1039_v46 = vmul.f32 %v1399_v44, %v982_v35 }
 0x2f4   : > { %v895_v49 = vpop.f32.mrf.mxu1 }
 0x2f5   : > { %v1055_v51 = vadd.f32 %v1039_v46, %v766_v43  ;;  %v1038_v53 = vmul.f32 %v977_v48, %v895_v49 }
 0x2f7   : > { %1071 = vst [vmem:[#allocation2 + $0x68] sm:$0xff] %v1055_v51  ;;  %v1054_v40 = vadd.f32 %v1038_v53, %v765_v37 }
 0x2f9   : > { %1070 = vst [vmem:[#allocation2 + $0x50] sm:$0xff] %v1054_v40 }
 0x2fa   : > { %v1402_v42 = vpop.f32.mrf.mxu1 }
 0x2fb   : > { %v1041_v56 = vmul.f32 %v1402_v42, %v992_v54 }
 0x2fc   : > { %v905_v59 = vpop.f32.mrf.mxu1 }
 0x2fd   : > { %v1057_v61 = vadd.f32 %v1041_v56, %v768_v55  ;;  %v1040_v62 = vmul.f32 %v987_v58, %v905_v59 }
 0x2ff   : > { %1073 = vst [vmem:[#allocation2 + $0x48] sm:$0xff] %v1057_v61  ;;  %v1056_v47 = vadd.f32 %v1040_v62, %v767_v45 }
 0x301   : > { %1072 = vst [vmem:[#allocation2 + $0x8] sm:$0xff] %v1056_v47  ;;  %v1405_v50 = vpop.f32.mrf.mxu1 }
 0x302   : > { %v1043_v2 = vmul.f32 %v1405_v50, %v1002_v63 }
 0x303   : > { %v915_v5 = vpop.f32.mrf.mxu1 }
 0x304   : > { %v1059_v57 = vadd.f32 %v1043_v2, %v770_v0  ;;  %v1042_v6 = vmul.f32 %v997_v52, %v915_v5 }
 0x306   : > { %1075 = vst [vmem:[#allocation2 + $0x20] sm:$0xff] %v1059_v57  ;;  %v1058_v60 = vadd.f32 %v1042_v6, %v769_v3 }
 0x308   : > { %1074 = vst [vmem:[#allocation2 + $0x40] sm:$0xff] %v1058_v60 }
 0x309   : > { %v1408_v8 = vpop.f32.mrf.mxu1 }
 0x30a   : > { %v1045_v4 = vmul.f32 %v1408_v8, %v1012_v7 }
 0x30b   : > { %v925_v9 = vpop.f32.mrf.mxu1 }
 0x30c   : > { %v1061_v13 = vadd.f32 %v1045_v4, %v772_v1  ;;  %v1044_v14 = vmul.f32 %v1007_v10, %v925_v9 }
 0x30e   : > { %1077 = vst [vmem:[#allocation2 + $0x38] sm:$0xff] %v1061_v13  ;;  %v1060_v12 = vadd.f32 %v1044_v14, %v771_v11 }
 0x310   : > { %1076 = vst [vmem:[#allocation2 + $0x10] sm:$0xff] %v1060_v12 }
 0x312   : > { %v1411_v17 = vpop.f32.mrf.mxu1 }
 0x313   : > { %v1047_v18 = vmul.f32 %v1411_v17, %v1022_v15 }
 0x314   : > { %v935_v20 = vpop.f32.mrf.mxu1 }
 0x315   : > { %v1063_v22 = vadd.f32 %v1047_v18, %v774_v16  ;;  %v1046_v23 = vmul.f32 %v1017_v19, %v935_v20 }
 0x317   : > { %1079 = vst [vmem:[#allocation2 + $0x70] sm:$0xff] %v1063_v22  ;;  %v1062_v24 = vadd.f32 %v1046_v23, %v773_v21 }
 0x319   : > { %1078 = vst [vmem:[#allocation2 + $0x60] sm:$0xff] %v1062_v24 }
 0x31a   : > { %v1414_v27 = vpop.f32.mrf.mxu1 }
 0x31b   : > { %v1049_v28 = vmul.f32 %v1414_v27, %v1032_v25 }
 0x31c   : > { %v945_v31 = vpop.f32.mrf.mxu1 }
 0x31d   : > { %v1065_v33 = vadd.f32 %v1049_v28, %v776_v26  ;;  %v1048_v34 = vmul.f32 %v1027_v29, %v945_v31 }
 0x31f   : > { %1081 = vst [vmem:[#allocation2 + $0x28] sm:$0xff] %v1065_v33  ;;  %v1064_v36 = vadd.f32 %v1048_v34, %v775_v30 }
 0x321   : > { %1080 = vst [vmem:[#allocation2 + $0x78] sm:$0xff] %v1064_v36 }
 0x322 PF: > { %s2818_s30 = sld [smem:[#allocation36_spill]] }
 0x328   : > { %p1319_p10 = scmp.ne.s32.totalorder %s2818_s30, 1 }
 0x32a   : > { %1085 = sbr.rel (%p1319_p10) target bundleno = 824 (0x338), region = 60 }
 0x32f   : > { %v1086_v32 = vld [vmem:[#allocation2 + $0x30] sm:$0xff]  ;;  %v1087_v38 = vld [vmem:[#allocation2] sm:$0xff]  ;;  %v1088_v39 = vld [vmem:[#allocation2 + $0x58] sm:$0xff] }
 0x330   : > { %1102 = vst [vmem:[%s2424_s15] sm:$0xff] %v1086_v32  ;;  %1103 = vst [vmem:[%s2424_s15 + $0x8] sm:$0xff] %v1087_v38  ;;  %v1089_v41 = vld [vmem:[#allocation2 + $0x18] sm:$0xff]  ;;  %v1090_v35 = vld [vmem:[#allocation2 + $0x50] sm:$0xff] }
 0x331   : > { %1104 = vst [vmem:[%s2424_s15 + $0x10] sm:$0xff] %v1088_v39  ;;  %v1091_v43 = vld [vmem:[#allocation2 + $0x68] sm:$0xff]  ;;  %1105 = vst [vmem:[%s2424_s15 + $0x18] sm:$0xff] %v1089_v41  ;;  %v1094_v48 = vld [vmem:[#allocation2 + $0x40] sm:$0xff] }
 0x332   : > { %1106 = vst [vmem:[%s2424_s15 + $0x20] sm:$0xff] %v1090_v35  ;;  %1107 = vst [vmem:[%s2424_s15 + $0x28] sm:$0xff] %v1091_v43  ;;  %v1092_v44 = vld [vmem:[#allocation2 + $0x8] sm:$0xff]  ;;  %v1095_v37 = vld [vmem:[#allocation2 + $0x20] sm:$0xff] }
 0x333   : > { %v1093_v46 = vld [vmem:[#allocation2 + $0x48] sm:$0xff]  ;;  %1108 = vst [vmem:[%s2424_s15 + $0x30] sm:$0xff] %v1092_v44  ;;  %1110 = vst [vmem:[%s2424_s15 + $0x40] sm:$0xff] %v1094_v48  ;;  %v1096_v49 = vld [vmem:[#allocation2 + $0x10] sm:$0xff] }
 0x334   : > { %1109 = vst [vmem:[%s2424_s15 + $0x38] sm:$0xff] %v1093_v46  ;;  %v1097_v51 = vld [vmem:[#allocation2 + $0x38] sm:$0xff]  ;;  %1111 = vst [vmem:[%s2424_s15 + $0x48] sm:$0xff] %v1095_v37  ;;  %v1098_v53 = vld [vmem:[#allocation2 + $0x60] sm:$0xff] }
 0x335   : > { %1112 = vst [vmem:[%s2424_s15 + $0x50] sm:$0xff] %v1096_v49  ;;  %1113 = vst [vmem:[%s2424_s15 + $0x58] sm:$0xff] %v1097_v51  ;;  %v1099_v40 = vld [vmem:[#allocation2 + $0x70] sm:$0xff]  ;;  %v1100_v54 = vld [vmem:[#allocation2 + $0x78] sm:$0xff] }
 0x336   : > { %1114 = vst [vmem:[%s2424_s15 + $0x60] sm:$0xff] %v1098_v53  ;;  %1115 = vst [vmem:[%s2424_s15 + $0x68] sm:$0xff] %v1099_v40  ;;  %v1101_v55 = vld [vmem:[#allocation2 + $0x28] sm:$0xff] }
 0x337   : > { %1116 = vst [vmem:[%s2424_s15 + $0x70] sm:$0xff] %v1100_v54  ;;  %1117 = vst [vmem:[%s2424_s15 + $0x78] sm:$0xff] %v1101_v55 }
 0x338 PF: > { %s2819_s8 = sld [smem:[#allocation37_spill]]  ;;  %s1132_s9 = sshll.u32 %s2424_s15, 4  ;;  %s2625_s9 = int_to_ptr.vmem [resolvable:$true] %s1132_s9 }
 0x339   : > { %s2820_s7 = sld [smem:[#allocation42_spill]]  ;;  %s2629_s3 = scalar_lea.sflag [#allocation9], %s375_s13 }
 0x33a   : > { %s2821_s26 = sld [smem:[#allocation51_spill]]  ;;  %s1781_s24 = scalar_lea.vmem %s2625_s9, 2048 }
 0x33b   : > { %p1782_p3 = scmp.ne.s32.totalorder %s2625_s9, %s1781_s24  ;;  %s1974_s22 = smov [#allocation13]  }
 0x33c   : > { %s1785_s27 = sshll.u32 %s1974_s22, 4  ;;  %s1786_s27 = int_to_ptr.vmem [resolvable:$false] %s1785_s27 }
 0x33d   : > { %s1787_s29 = scalar_lea.vmem %s1786_s27, 4096  ;;  %p1788_p9 = scmp.lt.s32.totalorder %s2625_s9, %s1786_s27 }
 0x33e   : > { %s1326_s19 = sshll.u32 %s2819_s8, 11  ;;  %p1789_p4 = scmp.lt.s32.totalorder %s1787_s29, %s1781_s24 }
 0x33f   : > { %p2822_p11 = scmp.ne.s32.totalorder %s2820_s7, 0 }
 0x340   : > { %s2622_s12 = scalar_lea.hbm %s2821_s26, %s1326_s19  ;;  %p1790_p12 = por %p1789_p4, %p1788_p9 }
 0x341   : > { %p1783_p0 = pnand %p1782_p3, %p2822_p11 }
 0x343   : > { %p1784_p8 = pneg %p1783_p0 }
 0x345   : > { %p1791_p13 = pnand %p1790_p12, %p1784_p8 }
 0x347   : > { %1794 = shalt.err (!%p1791_p13)
}
 0x348   : > { %s1795_s13 = scalar_lea.hbm %s2622_s12, 2048  ;;  %s1799_s16 = scalar_lea.hbm %s2821_s26, 24576 }
 0x349   : > { %p1796_p5 = scmp.ne.s32.totalorder %s2622_s12, %s1795_s13  ;;  %p1800_p2 = scmp.lt.s32.totalorder %s2622_s12, %s2821_s26 }
 0x34a   : > { %p1801_p7 = scmp.lt.s32.totalorder %s1799_s16, %s1795_s13 }
 0x34b   : > { %p1797_p6 = pnand %p1796_p5, %p2822_p11 }
 0x34c   : > { %p1802_p10 = por %p1801_p7, %p1800_p2 }
 0x34d   : > { %p1798_p1 = pneg %p1797_p6 }
 0x34f   : > { %p1803_p3 = pnand %p1802_p10, %p1798_p1 }
 0x351   : > { %1806 = shalt.err (!%p1803_p3)
}
 0x352   : > { %s1975_s15 = smov 128   ;;  %s1976_s20 = smov 8  }
 0x353   : > { %1431 = dma.vmem_to_hbm [thread:$0]  (%p2822_p11), %s2625_s9, 2048, %s2622_s12, %s2629_s3, %s1975_s15, %s1975_s15, %s1976_s20  }
 0x354 PF: > { %s2823_s25 = sld [smem:[#allocation29_spill]]  ;;  %p1458_p0 = scmp.ge.s32.totalorder %s1959_s23, 2 }
 0x355   : > { %s2824_s2 = sld [smem:[#allocation45_spill]] }
 0x35a   : > { %s1147_s30 = sand.u32 1, %s2823_s25  }
 0x35b   : > { %p2825_p8 = scmp.ne.s32.totalorder %s2824_s2, 0  ;;  %s1148_s8 = scalar_lea.sflag [#allocation9], %s1147_s30 }
 0x35d   : > { %p1454_p9 = pnand %p1458_p0, %p2825_p8 }
 0x35f   : > { %p1455_p4 = pneg %p1454_p9 }
 0x361   : > { %1890 = dma.done.wait (%p1455_p4), %s1148_s8, 2048  }
 0x362   : > { %1892 = vsyncadd (%p1455_p4), %s1148_s8, 4294965248  ;;  %s34_s23 = sadd.s32 1, %s1959_s23   ;;  %s2827_s7 = sld [smem:[#allocation30_spill]] }
 0x363   : > { %p2657_p12 = scmp.ge.s32.totalorder %s34_s23, 26   ;;  %s2828_s11 = sld [smem:[#allocation43_spill]] }
 0x364   : > { %s2829_s1 = sld [smem:[#allocation32_spill]]  ;;  %s2838_s0 = smov %s1899_s10 }
 0x365   : > { %s2830_s12 = sld [smem:[#allocation33_spill]]  ;;  %s2841_s2 = smov %s2865_s14 }
 0x366   : > { %s2831_s13 = sld [smem:[#allocation34_spill]]  ;;  %s2843_s16 = smov %s1935_s17 }
 0x367   : > { %s2832_s28 = sld [smem:[#allocation35_spill]]  ;;  %s2844_s17 = smov %s1939_s18 }
 0x368   : > { %s2833_s15 = sld [smem:[#allocation44_spill]]  ;;  %s2839_s10 = smov %s2827_s7 }
 0x369   : > { %s2834_s9 = sld [smem:[#allocation46_spill]]  ;;  %s2846_s19 = smov %s1951_s21 }
 0x36a   : > { %s2835_s20 = sld [smem:[#allocation38_spill]] }
 0x36b   : > { %s2836_s3 = sld [smem:[#allocation39_spill]] }
 0x36c   : > { %s2837_s22 = sld [smem:[#allocation40_spill]] }
 0x36d   : > { %s2842_s14 = smov %s2832_s28  ;;  %33 = sbr.rel (!%p2657_p12) target bundleno = 26 (0x1a), region = 120 }
 0x36f   : > { %s2845_s18 = smov %s2834_s9 }
 0x371   : > { %s2847_s21 = smov %s2836_s3 }
 0x372   :  { %1153 = vsyncpa [#allocation8], 1 }
 0x373   :  { %1155 = vsyncpa [#allocation8 + $0x1], 1 }
 0x374   :  { %1156 = vsyncpa [#allocation11], 1 }
 0x375   :  { %1158 = vsyncpa [#allocation11 + $0x1], 1 }
 0x376   :  { %1159 = vsyncpa [#allocation9], 1 }
 0x377   :  { %1161 = vsyncpa [#allocation9 + $0x1], 1 }

</bundles_post_ra>
